<compile_context>
chip_gen: v5e
topology: v5e:2x2
jax: 0.10.0
libtpu: 0.0.40
codegen_flags: <defaults>
</compile_context>

<pallas_src>
import jax
import jax.numpy as jnp
from jax.experimental import pallas as pl
from jax.experimental.pallas import tpu as pltpu

NUM_LAYERS = 2
EPS_ATOM = (0.1, 0.2)     # GINEConv train_eps (deterministic synthetic values)
EPS_FRAG = (0.05, 0.15)   # GINConv  train_eps


def frag_gnn_kernel(
    x_ref, frag_ref, eattr_ref,
    gsrc_ref, sdst_ref, aff_ref, cf2a_ref, ca2f_ref,
    inva_ref, invf_ref,
    wenc_ref, benc_ref, wfenc_ref, bfenc_ref,
    wbcat_ref, bbcat_ref,
    w1_ref, b1_ref, w2_ref, b2_ref,
    wf1_ref, bf1_ref, wf2_ref, bf2_ref,
    wf2a_ref, bf2a_ref, wa2f_ref, ba2f_ref,
    wao1_ref, bao1_ref, wao2_ref, bao2_ref,
    wo1_ref, bo1_ref, wo2_ref, bo2_ref,
    out_ref):
  bf16 = jnp.bfloat16

  def mm(a, b):
    # MXU matmul: bf16 inputs, f32 accumulation.
    return jnp.dot(a.astype(bf16), b.astype(bf16),
                   preferred_element_type=jnp.float32)

  relu = lambda v: jnp.maximum(v, 0.0)
  H = benc_ref.shape[-1]

  # Encoders (linear atom / fragment encoders); activations stay f32.
  atom = mm(x_ref[...], wenc_ref[...]) + benc_ref[...]          # [Na, H]
  frag = mm(frag_ref[...], wfenc_ref[...]) + bfenc_ref[...]     # [Nf, H]

  # Both layers' (BondEncoder o GINEConv-edge-Linear) in one wide matmul.
  e_all = mm(eattr_ref[...], wbcat_ref[...]) + bbcat_ref[...]   # [Ne, L*H]

  inv_a = inva_ref[...]                                         # [Na, 1] f32
  inv_f = invf_ref[...]                                         # [Nf, 1] f32

  for l in range(NUM_LAYERS):
    e = e_all[:, l * H:(l + 1) * H]                             # [Ne, H]

    # GINEConv on atoms: agg_i = sum_{(j->i)} relu(x_j + e_ji), then the MLP
    # (Linear/BN folded/ReLU/Linear) and the outer atom BN (folded) + ReLU.
    msg = relu(mm(gsrc_ref[...], atom) + e)                     # [Ne, H]
    agg = mm(sdst_ref[...], msg)                                # [Na, H]
    h = (1.0 + EPS_ATOM[l]) * atom + agg
    h = relu(mm(h, w1_ref[l]) + b1_ref[l])                      # Linear+BN+ReLU
    atom = relu(mm(h, w2_ref[l]) + b2_ref[l])                   # Linear+BN+ReLU

    # GINConv on the fragment graph (adjacency precomposed, sum aggregation).
    fagg = mm(aff_ref[...], frag)                               # [Nf, H]
    fh = (1.0 + EPS_FRAG[l]) * frag + fagg
    fh = relu(mm(fh, wf1_ref[l]) + bf1_ref[l])                  # Linear+BN+ReLU
    frag = relu(mm(fh, wf2_ref[l]) + bf2_ref[l])                # Linear+BN+ReLU

    # InterMessage fragment -> atom: Linear+ReLU per fragment, then
    # scatter-mean over bipartite edges (integer counts on MXU, 1/cnt in f32).
    mf = relu(mm(frag, wf2a_ref[l]) + bf2a_ref[l])              # [Nf, H]
    atom = atom + inv_a * mm(cf2a_ref[...], mf)                 # [Na, H]

    # InterMessage atom -> fragment (uses the *updated* atoms, as in torch).
    ma = relu(mm(atom, wa2f_ref[l]) + ba2f_ref[l])              # [Na, H]
    frag = frag + inv_f * mm(ca2f_ref[...], ma)                 # [Nf, H]

  # atom_out MLP (2 layers, both ReLU).  frag_out is dead code when
  # graph_rep / graph_rep_node are False, so it is not materialized.
  atom = relu(mm(atom, wao1_ref[...]) + bao1_ref[...])
  atom = relu(mm(atom, wao2_ref[...]) + bao2_ref[...])
  # out MLP (num_layers_out = 2, last_relu = False); last layer zero-padded to
  # 128 output lanes for an unmasked lane-dense store (sliced in wrapper).
  y = relu(mm(atom, wo1_ref[...]) + bo1_ref[...])
  out_ref[...] = mm(y, wo2_ref[...]) + bo2_ref[...]


def frag_gnn_forward(inputs, out_shape):
  vmem = pltpu.MemorySpace.VMEM
  return pl.pallas_call(
      frag_gnn_kernel,
      out_shape=jax.ShapeDtypeStruct(out_shape, jnp.float32),
      in_specs=[pl.BlockSpec(memory_space=vmem) for _ in inputs],
      out_specs=pl.BlockSpec(memory_space=vmem),
      compiler_params=pltpu.CompilerParams(
          # Raise v5e's 16 MiB default scoped VMEM; stays within v7x's 64 MiB.
          vmem_limit_bytes=32 * 1024 * 1024),
  )(*inputs)


if __name__ == "__main__":
  # ---- sizes (small, consistent with the module) ----
  Na, Nf = 32, 16           # atoms, fragments
  Ne, Ef, Eb = 64, 24, 48   # atom edges, fragment-fragment edges, atom-fragment edges
  Cin, Csub, Ce = 16, 8, 8  # in_channels, in_channels_substructure, in_channels_edge
  H, Cout, L = 32, 8, NUM_LAYERS
  OUT_PAD = 128             # lane-dense output slab width

  keys = iter(jax.random.split(jax.random.PRNGKey(0), 256))

  def nrm(shape, scale=0.1):
    return scale * jax.random.normal(next(keys), shape, jnp.float32)

  def ints(n, hi):
    return jax.random.randint(next(keys), (n,), 0, hi)

  # ---- synthetic graph data ----
  x = nrm((Na, Cin), 1.0)
  fragments = nrm((Nf, Csub), 1.0)
  edge_attr = nrm((Ne, Ce), 1.0)
  edge_src, edge_dst = ints(Ne, Na), ints(Ne, Na)      # edge_index
  fe_src, fe_dst = ints(Ef, Nf), ints(Ef, Nf)          # fragment-fragment edges
  b_row, b_col = ints(Eb, Na), ints(Eb, Nf)            # fragments_edge_index (atom, frag)

  one_hot = lambda idx, n: jax.nn.one_hot(idx, n, dtype=jnp.float32)

  # Incidence operators.  Values are 0/1 or small integer counts -> exact in
  # bf16; the scatter-mean 1/count scale is kept separate in f32.
  G_src = one_hot(edge_src, Na)                        # gather atom sources   [Ne, Na]
  S_dst = one_hot(edge_dst, Na).T                      # scatter-add to atoms  [Na, Ne]
  A_ff = one_hot(fe_dst, Nf).T @ one_hot(fe_src, Nf)   # frag adjacency (sum)  [Nf, Nf]
  OH_row = one_hot(b_row, Na)                          # [Eb, Na]
  OH_col = one_hot(b_col, Nf)                          # [Eb, Nf]
  C_f2a = OH_row.T @ OH_col                            # bipartite counts      [Na, Nf]
  C_a2f = OH_col.T @ OH_row                            # bipartite counts      [Nf, Na]
  inv_a = (1.0 / jnp.maximum(OH_row.sum(axis=0), 1.0))[:, None]   # [Na, 1] f32
  inv_f = (1.0 / jnp.maximum(OH_col.sum(axis=0), 1.0))[:, None]   # [Nf, 1] f32

  # ---- deterministic parameters ----
  def bn_fold(c):
    # Inference-mode BatchNorm1d (running stats): y = x*s + t.
    gamma = 1.0 + nrm((1, c))
    beta = nrm((1, c))
    mean = nrm((1, c))
    var = 1.0 + 0.1 * jnp.abs(nrm((1, c)))
    s = gamma * jax.lax.rsqrt(var + 1e-5)
    return s, beta - mean * s

  W_enc, b_enc = nrm((Cin, H)), nrm((1, H))
  W_fenc, b_fenc = nrm((Csub, H)), nrm((1, H))

  # BondEncoder (Linear) composed with GINEConv's edge_dim Linear(H, H).
  Wb = [nrm((Ce, H)) for _ in range(L)]
  bb = [nrm((1, H)) for _ in range(L)]
  Wel = [nrm((H, H)) for _ in range(L)]
  bel = [nrm((1, H)) for _ in range(L)]
  Wb_eff = [Wb[l] @ Wel[l] for l in range(L)]
  bb_eff = [bb[l] @ Wel[l] + bel[l] for l in range(L)]
  Wb_cat = jnp.concatenate(Wb_eff, axis=1)             # (Ce, L*H)
  bb_cat = jnp.concatenate(bb_eff, axis=1)             # (1,  L*H)

  # GINEConv atom MLPs + outer atom BatchNorms.
  W1 = [nrm((H, 2 * H)) for _ in range(L)]
  b1 = [nrm((1, 2 * H)) for _ in range(L)]
  bn1 = [bn_fold(2 * H) for _ in range(L)]
  W2 = [nrm((2 * H, H)) for _ in range(L)]
  b2 = [nrm((1, H)) for _ in range(L)]
  bnA = [bn_fold(H) for _ in range(L)]
  # GINConv fragment MLPs + outer fragment BatchNorms.
  Wf1 = [nrm((H, 2 * H)) for _ in range(L)]
  bf1 = [nrm((1, 2 * H)) for _ in range(L)]
  bnf1 = [bn_fold(2 * H) for _ in range(L)]
  Wf2 = [nrm((2 * H, H)) for _ in range(L)]
  bf2 = [nrm((1, H)) for _ in range(L)]
  bnF = [bn_fold(H) for _ in range(L)]
  # InterMessage linears (frag->atom, atom->frag).
  Wf2a = [nrm((H, H)) for _ in range(L)]
  bf2a = [nrm((1, H)) for _ in range(L)]
  Wa2f = [nrm((H, H)) for _ in range(L)]
  ba2f = [nrm((1, H)) for _ in range(L)]

  Wao1, bao1 = nrm((H, H)), nrm((1, H))
  Wao2, bao2 = nrm((H, H)), nrm((1, H))
  Wo1, bo1 = nrm((H, Cout)), nrm((1, Cout))
  Wo2, bo2 = nrm((Cout, Cout)), nrm((1, Cout))

  # Fold each BatchNorm into its preceding Linear (W*s, b*s + t).
  def fold(Ws, bs, bns):
    Wf = jnp.stack([Ws[l] * bns[l][0] for l in range(L)])
    bf = jnp.stack([bs[l] * bns[l][0] + bns[l][1] for l in range(L)])
    return Wf, bf

  W1_f, b1_f = fold(W1, b1, bn1)        # [L, H, 2H], [L, 1, 2H]
  W2_f, b2_f = fold(W2, b2, bnA)        # [L, 2H, H], [L, 1, H]
  Wf1_f, bf1_f = fold(Wf1, bf1, bnf1)
  Wf2_f, bf2_f = fold(Wf2, bf2, bnF)

  # Zero-pad the final Linear to 128 output lanes -> unmasked lane-dense store.
  Wo2_pad = jnp.zeros((Cout, OUT_PAD), jnp.float32).at[:, :Cout].set(Wo2)
  bo2_pad = jnp.zeros((1, OUT_PAD), jnp.float32).at[:, :Cout].set(bo2)

  b16 = lambda a: a.astype(jnp.bfloat16)   # MXU-side operands only
  stk = jnp.stack

  inputs = [
      b16(x), b16(fragments), b16(edge_attr),
      b16(G_src), b16(S_dst), b16(A_ff), b16(C_f2a), b16(C_a2f),
      inv_a, inv_f,
      b16(W_enc), b_enc, b16(W_fenc), b_fenc,
      b16(Wb_cat), bb_cat,
      b16(W1_f), b1_f, b16(W2_f), b2_f,
      b16(Wf1_f), bf1_f, b16(Wf2_f), bf2_f,
      b16(stk(Wf2a)), stk(bf2a), b16(stk(Wa2f)), stk(ba2f),
      b16(Wao1), bao1, b16(Wao2), bao2,
      b16(Wo1), bo1, b16(Wo2_pad), bo2_pad,
  ]

  out_pad = frag_gnn_forward(inputs, (Na, OUT_PAD))
  out_pad = jax.block_until_ready(out_pad)
  out = out_pad[:, :Cout]
  assert out.shape == (Na, Cout)
  assert bool(jnp.all(jnp.isfinite(out)))

  # ---- pure-f32 JAX reference (un-folded BN, un-composed edge Linear) ----
  def reference():
    relu = lambda v: jnp.maximum(v, 0.0)
    atom = x @ W_enc + b_enc
    frag = fragments @ W_fenc + b_fenc
    for l in range(L):
      e = (edge_attr @ Wb[l] + bb[l]) @ Wel[l] + bel[l]
      msg = relu(G_src @ atom + e)
      agg = S_dst @ msg
      h = (1.0 + EPS_ATOM[l]) * atom + agg
      s, t = bn1[l]
      h = relu((h @ W1[l] + b1[l]) * s + t)
      s, t = bnA[l]
      atom = relu((h @ W2[l] + b2[l]) * s + t)
      fagg = A_ff @ frag
      fh = (1.0 + EPS_FRAG[l]) * frag + fagg
      s, t = bnf1[l]
      fh = relu((fh @ Wf1[l] + bf1[l]) * s + t)
      s, t = bnF[l]
      frag = relu((fh @ Wf2[l] + bf2[l]) * s + t)
      mf = relu(frag @ Wf2a[l] + bf2a[l])
      atom = atom + inv_a * (C_f2a @ mf)
      ma = relu(atom @ Wa2f[l] + ba2f[l])
      frag = frag + inv_f * (C_a2f @ ma)
    atom = relu(atom @ Wao1 + bao1)
    atom = relu(atom @ Wao2 + bao2)
    y = relu(atom @ Wo1 + bo1)
    return y @ Wo2 + bo2

  ref = reference()
  err = float(jnp.max(jnp.abs(out - ref)))
  assert err < 5e-2, f"kernel/reference mismatch: max abs err {err}"
  print("KERNEL_OK")
</pallas_src>

<mosaic_0001>
module attributes {stable_mosaic.version = 11 : i64} {
  func.func @frag_gnn_kernel(%arg0: memref<32x16xbf16, #tpu.memory_space<vmem>>, %arg1: memref<16x8xbf16, #tpu.memory_space<vmem>>, %arg2: memref<64x8xbf16, #tpu.memory_space<vmem>>, %arg3: memref<64x32xbf16, #tpu.memory_space<vmem>>, %arg4: memref<32x64xbf16, #tpu.memory_space<vmem>>, %arg5: memref<16x16xbf16, #tpu.memory_space<vmem>>, %arg6: memref<32x16xbf16, #tpu.memory_space<vmem>>, %arg7: memref<16x32xbf16, #tpu.memory_space<vmem>>, %arg8: memref<32x1xf32, #tpu.memory_space<vmem>>, %arg9: memref<16x1xf32, #tpu.memory_space<vmem>>, %arg10: memref<16x32xbf16, #tpu.memory_space<vmem>>, %arg11: memref<1x32xf32, #tpu.memory_space<vmem>>, %arg12: memref<8x32xbf16, #tpu.memory_space<vmem>>, %arg13: memref<1x32xf32, #tpu.memory_space<vmem>>, %arg14: memref<8x64xbf16, #tpu.memory_space<vmem>>, %arg15: memref<1x64xf32, #tpu.memory_space<vmem>>, %arg16: memref<2x32x64xbf16, #tpu.memory_space<vmem>>, %arg17: memref<2x1x64xf32, #tpu.memory_space<vmem>>, %arg18: memref<2x64x32xbf16, #tpu.memory_space<vmem>>, %arg19: memref<2x1x32xf32, #tpu.memory_space<vmem>>, %arg20: memref<2x32x64xbf16, #tpu.memory_space<vmem>>, %arg21: memref<2x1x64xf32, #tpu.memory_space<vmem>>, %arg22: memref<2x64x32xbf16, #tpu.memory_space<vmem>>, %arg23: memref<2x1x32xf32, #tpu.memory_space<vmem>>, %arg24: memref<2x32x32xbf16, #tpu.memory_space<vmem>>, %arg25: memref<2x1x32xf32, #tpu.memory_space<vmem>>, %arg26: memref<2x32x32xbf16, #tpu.memory_space<vmem>>, %arg27: memref<2x1x32xf32, #tpu.memory_space<vmem>>, %arg28: memref<32x32xbf16, #tpu.memory_space<vmem>>, %arg29: memref<1x32xf32, #tpu.memory_space<vmem>>, %arg30: memref<32x32xbf16, #tpu.memory_space<vmem>>, %arg31: memref<1x32xf32, #tpu.memory_space<vmem>>, %arg32: memref<32x8xbf16, #tpu.memory_space<vmem>>, %arg33: memref<1x8xf32, #tpu.memory_space<vmem>>, %arg34: memref<8x128xbf16, #tpu.memory_space<vmem>>, %arg35: memref<1x128xf32, #tpu.memory_space<vmem>>, %arg36: memref<32x128xf32, #tpu.memory_space<vmem>>) attributes {dimension_semantics = [], scalar_prefetch = 0 : i64, scratch_operands = 0 : i64, tpu.core_type = #tpu.core_type<tc>} {
    %c0 = arith.constant 0 : index
    %c0_0 = arith.constant 0 : index
    %0 = vector.load %arg0[%c0, %c0_0] : memref<32x16xbf16, #tpu.memory_space<vmem>>, vector<32x16xbf16>
    %c0_1 = arith.constant 0 : index
    %c0_2 = arith.constant 0 : index
    %1 = vector.load %arg10[%c0_1, %c0_2] : memref<16x32xbf16, #tpu.memory_space<vmem>>, vector<16x32xbf16>
    %cst = arith.constant dense<0.000000e+00> : vector<32x32xf32>
    %2 = tpu.matmul %0, %1, %cst {dimension_numbers = #tpu.dot_dimension_numbers<[1], [0], [0], [1], [0, 0, 1, 1], [], []>} : vector<32x16xbf16>, vector<16x32xbf16>, vector<32x32xf32> -> vector<32x32xf32>
    %c0_3 = arith.constant 0 : index
    %c0_4 = arith.constant 0 : index
    %3 = vector.load %arg11[%c0_3, %c0_4] : memref<1x32xf32, #tpu.memory_space<vmem>>, vector<1x32xf32>
    %4 = vector.broadcast %3 : vector<1x32xf32> to vector<32x32xf32>
    %5 = arith.addf %2, %4 : vector<32x32xf32>
    %c0_5 = arith.constant 0 : index
    %c0_6 = arith.constant 0 : index
    %6 = vector.load %arg1[%c0_5, %c0_6] : memref<16x8xbf16, #tpu.memory_space<vmem>>, vector<16x8xbf16>
    %c0_7 = arith.constant 0 : index
    %c0_8 = arith.constant 0 : index
    %7 = vector.load %arg12[%c0_7, %c0_8] : memref<8x32xbf16, #tpu.memory_space<vmem>>, vector<8x32xbf16>
    %cst_9 = arith.constant dense<0.000000e+00> : vector<16x32xf32>
    %8 = tpu.matmul %6, %7, %cst_9 {dimension_numbers = #tpu.dot_dimension_numbers<[1], [0], [0], [1], [0, 0, 1, 1], [], []>} : vector<16x8xbf16>, vector<8x32xbf16>, vector<16x32xf32> -> vector<16x32xf32>
    %c0_10 = arith.constant 0 : index
    %c0_11 = arith.constant 0 : index
    %9 = vector.load %arg13[%c0_10, %c0_11] : memref<1x32xf32, #tpu.memory_space<vmem>>, vector<1x32xf32>
    %10 = vector.broadcast %9 : vector<1x32xf32> to vector<16x32xf32>
    %11 = arith.addf %8, %10 : vector<16x32xf32>
    %c0_12 = arith.constant 0 : index
    %c0_13 = arith.constant 0 : index
    %12 = vector.load %arg2[%c0_12, %c0_13] : memref<64x8xbf16, #tpu.memory_space<vmem>>, vector<64x8xbf16>
    %c0_14 = arith.constant 0 : index
    %c0_15 = arith.constant 0 : index
    %13 = vector.load %arg14[%c0_14, %c0_15] : memref<8x64xbf16, #tpu.memory_space<vmem>>, vector<8x64xbf16>
    %cst_16 = arith.constant dense<0.000000e+00> : vector<64x64xf32>
    %14 = tpu.matmul %12, %13, %cst_16 {dimension_numbers = #tpu.dot_dimension_numbers<[1], [0], [0], [1], [0, 0, 1, 1], [], []>} : vector<64x8xbf16>, vector<8x64xbf16>, vector<64x64xf32> -> vector<64x64xf32>
    %c0_17 = arith.constant 0 : index
    %c0_18 = arith.constant 0 : index
    %15 = vector.load %arg15[%c0_17, %c0_18] : memref<1x64xf32, #tpu.memory_space<vmem>>, vector<1x64xf32>
    %16 = vector.broadcast %15 : vector<1x64xf32> to vector<64x64xf32>
    %17 = arith.addf %14, %16 : vector<64x64xf32>
    %c0_19 = arith.constant 0 : index
    %c0_20 = arith.constant 0 : index
    %18 = vector.load %arg8[%c0_19, %c0_20] : memref<32x1xf32, #tpu.memory_space<vmem>>, vector<32x1xf32>
    %c0_21 = arith.constant 0 : index
    %c0_22 = arith.constant 0 : index
    %19 = vector.load %arg9[%c0_21, %c0_22] : memref<16x1xf32, #tpu.memory_space<vmem>>, vector<16x1xf32>
    %20 = vector.extract_strided_slice %17 {offsets = [0, 0], sizes = [64, 32], strides = [1, 1]} : vector<64x64xf32> to vector<64x32xf32>
    %c0_23 = arith.constant 0 : index
    %c0_24 = arith.constant 0 : index
    %21 = vector.load %arg3[%c0_23, %c0_24] : memref<64x32xbf16, #tpu.memory_space<vmem>>, vector<64x32xbf16>
    %22 = arith.truncf %5 : vector<32x32xf32> to vector<32x32xbf16>
    %cst_25 = arith.constant dense<0.000000e+00> : vector<64x32xf32>
    %23 = tpu.matmul %21, %22, %cst_25 {dimension_numbers = #tpu.dot_dimension_numbers<[1], [0], [0], [1], [0, 0, 1, 1], [], []>} : vector<64x32xbf16>, vector<32x32xbf16>, vector<64x32xf32> -> vector<64x32xf32>
    %24 = arith.addf %23, %20 : vector<64x32xf32>
    %cst_26 = arith.constant 0.000000e+00 : f32
    %25 = vector.broadcast %cst_26 : f32 to vector<64x32xf32>
    %26 = arith.maximumf %24, %25 : vector<64x32xf32>
    %c0_27 = arith.constant 0 : index
    %c0_28 = arith.constant 0 : index
    %27 = vector.load %arg4[%c0_27, %c0_28] : memref<32x64xbf16, #tpu.memory_space<vmem>>, vector<32x64xbf16>
    %28 = arith.truncf %26 : vector<64x32xf32> to vector<64x32xbf16>
    %cst_29 = arith.constant dense<0.000000e+00> : vector<32x32xf32>
    %29 = tpu.matmul %27, %28, %cst_29 {dimension_numbers = #tpu.dot_dimension_numbers<[1], [0], [0], [1], [0, 0, 1, 1], [], []>} : vector<32x64xbf16>, vector<64x32xbf16>, vector<32x32xf32> -> vector<32x32xf32>
    %cst_30 = arith.constant 1.100000e+00 : f32
    %30 = vector.broadcast %cst_30 : f32 to vector<32x32xf32>
    %31 = arith.mulf %30, %5 : vector<32x32xf32>
    %32 = arith.addf %31, %29 : vector<32x32xf32>
    %c0_31 = arith.constant 0 : index
    %c0_32 = arith.constant 0 : index
    %c0_33 = arith.constant 0 : index
    %33 = vector.load %arg16[%c0_31, %c0_32, %c0_33] : memref<2x32x64xbf16, #tpu.memory_space<vmem>>, vector<1x32x64xbf16>
    %34 = vector.shape_cast %33 : vector<1x32x64xbf16> to vector<32x64xbf16>
    %35 = arith.truncf %32 : vector<32x32xf32> to vector<32x32xbf16>
    %cst_34 = arith.constant dense<0.000000e+00> : vector<32x64xf32>
    %36 = tpu.matmul %35, %34, %cst_34 {dimension_numbers = #tpu.dot_dimension_numbers<[1], [0], [0], [1], [0, 0, 1, 1], [], []>} : vector<32x32xbf16>, vector<32x64xbf16>, vector<32x64xf32> -> vector<32x64xf32>
    %c0_35 = arith.constant 0 : index
    %c0_36 = arith.constant 0 : index
    %c0_37 = arith.constant 0 : index
    %37 = vector.load %arg17[%c0_35, %c0_36, %c0_37] : memref<2x1x64xf32, #tpu.memory_space<vmem>>, vector<1x1x64xf32>
    %38 = vector.shape_cast %37 : vector<1x1x64xf32> to vector<1x64xf32>
    %39 = vector.broadcast %38 : vector<1x64xf32> to vector<32x64xf32>
    %40 = arith.addf %36, %39 : vector<32x64xf32>
    %cst_38 = arith.constant 0.000000e+00 : f32
    %41 = vector.broadcast %cst_38 : f32 to vector<32x64xf32>
    %42 = arith.maximumf %40, %41 : vector<32x64xf32>
    %c0_39 = arith.constant 0 : index
    %c0_40 = arith.constant 0 : index
    %c0_41 = arith.constant 0 : index
    %43 = vector.load %arg18[%c0_39, %c0_40, %c0_41] : memref<2x64x32xbf16, #tpu.memory_space<vmem>>, vector<1x64x32xbf16>
    %44 = vector.shape_cast %43 : vector<1x64x32xbf16> to vector<64x32xbf16>
    %45 = arith.truncf %42 : vector<32x64xf32> to vector<32x64xbf16>
    %cst_42 = arith.constant dense<0.000000e+00> : vector<32x32xf32>
    %46 = tpu.matmul %45, %44, %cst_42 {dimension_numbers = #tpu.dot_dimension_numbers<[1], [0], [0], [1], [0, 0, 1, 1], [], []>} : vector<32x64xbf16>, vector<64x32xbf16>, vector<32x32xf32> -> vector<32x32xf32>
    %c0_43 = arith.constant 0 : index
    %c0_44 = arith.constant 0 : index
    %c0_45 = arith.constant 0 : index
    %47 = vector.load %arg19[%c0_43, %c0_44, %c0_45] : memref<2x1x32xf32, #tpu.memory_space<vmem>>, vector<1x1x32xf32>
    %48 = vector.shape_cast %47 : vector<1x1x32xf32> to vector<1x32xf32>
    %49 = vector.broadcast %48 : vector<1x32xf32> to vector<32x32xf32>
    %50 = arith.addf %46, %49 : vector<32x32xf32>
    %cst_46 = arith.constant 0.000000e+00 : f32
    %51 = vector.broadcast %cst_46 : f32 to vector<32x32xf32>
    %52 = arith.maximumf %50, %51 : vector<32x32xf32>
    %c0_47 = arith.constant 0 : index
    %c0_48 = arith.constant 0 : index
    %53 = vector.load %arg5[%c0_47, %c0_48] : memref<16x16xbf16, #tpu.memory_space<vmem>>, vector<16x16xbf16>
    %54 = arith.truncf %11 : vector<16x32xf32> to vector<16x32xbf16>
    %cst_49 = arith.constant dense<0.000000e+00> : vector<16x32xf32>
    %55 = tpu.matmul %53, %54, %cst_49 {dimension_numbers = #tpu.dot_dimension_numbers<[1], [0], [0], [1], [0, 0, 1, 1], [], []>} : vector<16x16xbf16>, vector<16x32xbf16>, vector<16x32xf32> -> vector<16x32xf32>
    %cst_50 = arith.constant 1.050000e+00 : f32
    %56 = vector.broadcast %cst_50 : f32 to vector<16x32xf32>
    %57 = arith.mulf %56, %11 : vector<16x32xf32>
    %58 = arith.addf %57, %55 : vector<16x32xf32>
    %c0_51 = arith.constant 0 : index
    %c0_52 = arith.constant 0 : index
    %c0_53 = arith.constant 0 : index
    %59 = vector.load %arg20[%c0_51, %c0_52, %c0_53] : memref<2x32x64xbf16, #tpu.memory_space<vmem>>, vector<1x32x64xbf16>
    %60 = vector.shape_cast %59 : vector<1x32x64xbf16> to vector<32x64xbf16>
    %61 = arith.truncf %58 : vector<16x32xf32> to vector<16x32xbf16>
    %cst_54 = arith.constant dense<0.000000e+00> : vector<16x64xf32>
    %62 = tpu.matmul %61, %60, %cst_54 {dimension_numbers = #tpu.dot_dimension_numbers<[1], [0], [0], [1], [0, 0, 1, 1], [], []>} : vector<16x32xbf16>, vector<32x64xbf16>, vector<16x64xf32> -> vector<16x64xf32>
    %c0_55 = arith.constant 0 : index
    %c0_56 = arith.constant 0 : index
    %c0_57 = arith.constant 0 : index
    %63 = vector.load %arg21[%c0_55, %c0_56, %c0_57] : memref<2x1x64xf32, #tpu.memory_space<vmem>>, vector<1x1x64xf32>
    %64 = vector.shape_cast %63 : vector<1x1x64xf32> to vector<1x64xf32>
    %65 = vector.broadcast %64 : vector<1x64xf32> to vector<16x64xf32>
    %66 = arith.addf %62, %65 : vector<16x64xf32>
    %cst_58 = arith.constant 0.000000e+00 : f32
    %67 = vector.broadcast %cst_58 : f32 to vector<16x64xf32>
    %68 = arith.maximumf %66, %67 : vector<16x64xf32>
    %c0_59 = arith.constant 0 : index
    %c0_60 = arith.constant 0 : index
    %c0_61 = arith.constant 0 : index
    %69 = vector.load %arg22[%c0_59, %c0_60, %c0_61] : memref<2x64x32xbf16, #tpu.memory_space<vmem>>, vector<1x64x32xbf16>
    %70 = vector.shape_cast %69 : vector<1x64x32xbf16> to vector<64x32xbf16>
    %71 = arith.truncf %68 : vector<16x64xf32> to vector<16x64xbf16>
    %cst_62 = arith.constant dense<0.000000e+00> : vector<16x32xf32>
    %72 = tpu.matmul %71, %70, %cst_62 {dimension_numbers = #tpu.dot_dimension_numbers<[1], [0], [0], [1], [0, 0, 1, 1], [], []>} : vector<16x64xbf16>, vector<64x32xbf16>, vector<16x32xf32> -> vector<16x32xf32>
    %c0_63 = arith.constant 0 : index
    %c0_64 = arith.constant 0 : index
    %c0_65 = arith.constant 0 : index
    %73 = vector.load %arg23[%c0_63, %c0_64, %c0_65] : memref<2x1x32xf32, #tpu.memory_space<vmem>>, vector<1x1x32xf32>
    %74 = vector.shape_cast %73 : vector<1x1x32xf32> to vector<1x32xf32>
    %75 = vector.broadcast %74 : vector<1x32xf32> to vector<16x32xf32>
    %76 = arith.addf %72, %75 : vector<16x32xf32>
    %cst_66 = arith.constant 0.000000e+00 : f32
    %77 = vector.broadcast %cst_66 : f32 to vector<16x32xf32>
    %78 = arith.maximumf %76, %77 : vector<16x32xf32>
    %c0_67 = arith.constant 0 : index
    %c0_68 = arith.constant 0 : index
    %c0_69 = arith.constant 0 : index
    %79 = vector.load %arg24[%c0_67, %c0_68, %c0_69] : memref<2x32x32xbf16, #tpu.memory_space<vmem>>, vector<1x32x32xbf16>
    %80 = vector.shape_cast %79 : vector<1x32x32xbf16> to vector<32x32xbf16>
    %81 = arith.truncf %78 : vector<16x32xf32> to vector<16x32xbf16>
    %cst_70 = arith.constant dense<0.000000e+00> : vector<16x32xf32>
    %82 = tpu.matmul %81, %80, %cst_70 {dimension_numbers = #tpu.dot_dimension_numbers<[1], [0], [0], [1], [0, 0, 1, 1], [], []>} : vector<16x32xbf16>, vector<32x32xbf16>, vector<16x32xf32> -> vector<16x32xf32>
    %c0_71 = arith.constant 0 : index
    %c0_72 = arith.constant 0 : index
    %c0_73 = arith.constant 0 : index
    %83 = vector.load %arg25[%c0_71, %c0_72, %c0_73] : memref<2x1x32xf32, #tpu.memory_space<vmem>>, vector<1x1x32xf32>
    %84 = vector.shape_cast %83 : vector<1x1x32xf32> to vector<1x32xf32>
    %85 = vector.broadcast %84 : vector<1x32xf32> to vector<16x32xf32>
    %86 = arith.addf %82, %85 : vector<16x32xf32>
    %cst_74 = arith.constant 0.000000e+00 : f32
    %87 = vector.broadcast %cst_74 : f32 to vector<16x32xf32>
    %88 = arith.maximumf %86, %87 : vector<16x32xf32>
    %c0_75 = arith.constant 0 : index
    %c0_76 = arith.constant 0 : index
    %89 = vector.load %arg6[%c0_75, %c0_76] : memref<32x16xbf16, #tpu.memory_space<vmem>>, vector<32x16xbf16>
    %90 = arith.truncf %88 : vector<16x32xf32> to vector<16x32xbf16>
    %cst_77 = arith.constant dense<0.000000e+00> : vector<32x32xf32>
    %91 = tpu.matmul %89, %90, %cst_77 {dimension_numbers = #tpu.dot_dimension_numbers<[1], [0], [0], [1], [0, 0, 1, 1], [], []>} : vector<32x16xbf16>, vector<16x32xbf16>, vector<32x32xf32> -> vector<32x32xf32>
    %92 = vector.broadcast %18 : vector<32x1xf32> to vector<32x32xf32>
    %93 = arith.mulf %92, %91 : vector<32x32xf32>
    %94 = arith.addf %52, %93 : vector<32x32xf32>
    %c0_78 = arith.constant 0 : index
    %c0_79 = arith.constant 0 : index
    %c0_80 = arith.constant 0 : index
    %95 = vector.load %arg26[%c0_78, %c0_79, %c0_80] : memref<2x32x32xbf16, #tpu.memory_space<vmem>>, vector<1x32x32xbf16>
    %96 = vector.shape_cast %95 : vector<1x32x32xbf16> to vector<32x32xbf16>
    %97 = arith.truncf %94 : vector<32x32xf32> to vector<32x32xbf16>
    %cst_81 = arith.constant dense<0.000000e+00> : vector<32x32xf32>
    %98 = tpu.matmul %97, %96, %cst_81 {dimension_numbers = #tpu.dot_dimension_numbers<[1], [0], [0], [1], [0, 0, 1, 1], [], []>} : vector<32x32xbf16>, vector<32x32xbf16>, vector<32x32xf32> -> vector<32x32xf32>
    %c0_82 = arith.constant 0 : index
    %c0_83 = arith.constant 0 : index
    %c0_84 = arith.constant 0 : index
    %99 = vector.load %arg27[%c0_82, %c0_83, %c0_84] : memref<2x1x32xf32, #tpu.memory_space<vmem>>, vector<1x1x32xf32>
    %100 = vector.shape_cast %99 : vector<1x1x32xf32> to vector<1x32xf32>
    %101 = vector.broadcast %100 : vector<1x32xf32> to vector<32x32xf32>
    %102 = arith.addf %98, %101 : vector<32x32xf32>
    %cst_85 = arith.constant 0.000000e+00 : f32
    %103 = vector.broadcast %cst_85 : f32 to vector<32x32xf32>
    %104 = arith.maximumf %102, %103 : vector<32x32xf32>
    %c0_86 = arith.constant 0 : index
    %c0_87 = arith.constant 0 : index
    %105 = vector.load %arg7[%c0_86, %c0_87] : memref<16x32xbf16, #tpu.memory_space<vmem>>, vector<16x32xbf16>
    %106 = arith.truncf %104 : vector<32x32xf32> to vector<32x32xbf16>
    %cst_88 = arith.constant dense<0.000000e+00> : vector<16x32xf32>
    %107 = tpu.matmul %105, %106, %cst_88 {dimension_numbers = #tpu.dot_dimension_numbers<[1], [0], [0], [1], [0, 0, 1, 1], [], []>} : vector<16x32xbf16>, vector<32x32xbf16>, vector<16x32xf32> -> vector<16x32xf32>
    %108 = vector.broadcast %19 : vector<16x1xf32> to vector<16x32xf32>
    %109 = arith.mulf %108, %107 : vector<16x32xf32>
    %110 = arith.addf %78, %109 : vector<16x32xf32>
    %111 = vector.extract_strided_slice %17 {offsets = [0, 32], sizes = [64, 32], strides = [1, 1]} : vector<64x64xf32> to vector<64x32xf32>
    %c0_89 = arith.constant 0 : index
    %c0_90 = arith.constant 0 : index
    %112 = vector.load %arg3[%c0_89, %c0_90] : memref<64x32xbf16, #tpu.memory_space<vmem>>, vector<64x32xbf16>
    %113 = arith.truncf %94 : vector<32x32xf32> to vector<32x32xbf16>
    %cst_91 = arith.constant dense<0.000000e+00> : vector<64x32xf32>
    %114 = tpu.matmul %112, %113, %cst_91 {dimension_numbers = #tpu.dot_dimension_numbers<[1], [0], [0], [1], [0, 0, 1, 1], [], []>} : vector<64x32xbf16>, vector<32x32xbf16>, vector<64x32xf32> -> vector<64x32xf32>
    %115 = arith.addf %114, %111 : vector<64x32xf32>
    %cst_92 = arith.constant 0.000000e+00 : f32
    %116 = vector.broadcast %cst_92 : f32 to vector<64x32xf32>
    %117 = arith.maximumf %115, %116 : vector<64x32xf32>
    %c0_93 = arith.constant 0 : index
    %c0_94 = arith.constant 0 : index
    %118 = vector.load %arg4[%c0_93, %c0_94] : memref<32x64xbf16, #tpu.memory_space<vmem>>, vector<32x64xbf16>
    %119 = arith.truncf %117 : vector<64x32xf32> to vector<64x32xbf16>
    %cst_95 = arith.constant dense<0.000000e+00> : vector<32x32xf32>
    %120 = tpu.matmul %118, %119, %cst_95 {dimension_numbers = #tpu.dot_dimension_numbers<[1], [0], [0], [1], [0, 0, 1, 1], [], []>} : vector<32x64xbf16>, vector<64x32xbf16>, vector<32x32xf32> -> vector<32x32xf32>
    %cst_96 = arith.constant 1.200000e+00 : f32
    %121 = vector.broadcast %cst_96 : f32 to vector<32x32xf32>
    %122 = arith.mulf %121, %94 : vector<32x32xf32>
    %123 = arith.addf %122, %120 : vector<32x32xf32>
    %c1 = arith.constant 1 : index
    %c0_97 = arith.constant 0 : index
    %c0_98 = arith.constant 0 : index
    %124 = vector.load %arg16[%c1, %c0_97, %c0_98] : memref<2x32x64xbf16, #tpu.memory_space<vmem>>, vector<1x32x64xbf16>
    %125 = vector.shape_cast %124 : vector<1x32x64xbf16> to vector<32x64xbf16>
    %126 = arith.truncf %123 : vector<32x32xf32> to vector<32x32xbf16>
    %cst_99 = arith.constant dense<0.000000e+00> : vector<32x64xf32>
    %127 = tpu.matmul %126, %125, %cst_99 {dimension_numbers = #tpu.dot_dimension_numbers<[1], [0], [0], [1], [0, 0, 1, 1], [], []>} : vector<32x32xbf16>, vector<32x64xbf16>, vector<32x64xf32> -> vector<32x64xf32>
    %c1_100 = arith.constant 1 : index
    %c0_101 = arith.constant 0 : index
    %c0_102 = arith.constant 0 : index
    %128 = vector.load %arg17[%c1_100, %c0_101, %c0_102] : memref<2x1x64xf32, #tpu.memory_space<vmem>>, vector<1x1x64xf32>
    %129 = vector.shape_cast %128 : vector<1x1x64xf32> to vector<1x64xf32>
    %130 = vector.broadcast %129 : vector<1x64xf32> to vector<32x64xf32>
    %131 = arith.addf %127, %130 : vector<32x64xf32>
    %cst_103 = arith.constant 0.000000e+00 : f32
    %132 = vector.broadcast %cst_103 : f32 to vector<32x64xf32>
    %133 = arith.maximumf %131, %132 : vector<32x64xf32>
    %c1_104 = arith.constant 1 : index
    %c0_105 = arith.constant 0 : index
    %c0_106 = arith.constant 0 : index
    %134 = vector.load %arg18[%c1_104, %c0_105, %c0_106] : memref<2x64x32xbf16, #tpu.memory_space<vmem>>, vector<1x64x32xbf16>
    %135 = vector.shape_cast %134 : vector<1x64x32xbf16> to vector<64x32xbf16>
    %136 = arith.truncf %133 : vector<32x64xf32> to vector<32x64xbf16>
    %cst_107 = arith.constant dense<0.000000e+00> : vector<32x32xf32>
    %137 = tpu.matmul %136, %135, %cst_107 {dimension_numbers = #tpu.dot_dimension_numbers<[1], [0], [0], [1], [0, 0, 1, 1], [], []>} : vector<32x64xbf16>, vector<64x32xbf16>, vector<32x32xf32> -> vector<32x32xf32>
    %c1_108 = arith.constant 1 : index
    %c0_109 = arith.constant 0 : index
    %c0_110 = arith.constant 0 : index
    %138 = vector.load %arg19[%c1_108, %c0_109, %c0_110] : memref<2x1x32xf32, #tpu.memory_space<vmem>>, vector<1x1x32xf32>
    %139 = vector.shape_cast %138 : vector<1x1x32xf32> to vector<1x32xf32>
    %140 = vector.broadcast %139 : vector<1x32xf32> to vector<32x32xf32>
    %141 = arith.addf %137, %140 : vector<32x32xf32>
    %cst_111 = arith.constant 0.000000e+00 : f32
    %142 = vector.broadcast %cst_111 : f32 to vector<32x32xf32>
    %143 = arith.maximumf %141, %142 : vector<32x32xf32>
    %c0_112 = arith.constant 0 : index
    %c0_113 = arith.constant 0 : index
    %144 = vector.load %arg5[%c0_112, %c0_113] : memref<16x16xbf16, #tpu.memory_space<vmem>>, vector<16x16xbf16>
    %145 = arith.truncf %110 : vector<16x32xf32> to vector<16x32xbf16>
    %cst_114 = arith.constant dense<0.000000e+00> : vector<16x32xf32>
    %146 = tpu.matmul %144, %145, %cst_114 {dimension_numbers = #tpu.dot_dimension_numbers<[1], [0], [0], [1], [0, 0, 1, 1], [], []>} : vector<16x16xbf16>, vector<16x32xbf16>, vector<16x32xf32> -> vector<16x32xf32>
    %cst_115 = arith.constant 1.150000e+00 : f32
    %147 = vector.broadcast %cst_115 : f32 to vector<16x32xf32>
    %148 = arith.mulf %147, %110 : vector<16x32xf32>
    %149 = arith.addf %148, %146 : vector<16x32xf32>
    %c1_116 = arith.constant 1 : index
    %c0_117 = arith.constant 0 : index
    %c0_118 = arith.constant 0 : index
    %150 = vector.load %arg20[%c1_116, %c0_117, %c0_118] : memref<2x32x64xbf16, #tpu.memory_space<vmem>>, vector<1x32x64xbf16>
    %151 = vector.shape_cast %150 : vector<1x32x64xbf16> to vector<32x64xbf16>
    %152 = arith.truncf %149 : vector<16x32xf32> to vector<16x32xbf16>
    %cst_119 = arith.constant dense<0.000000e+00> : vector<16x64xf32>
    %153 = tpu.matmul %152, %151, %cst_119 {dimension_numbers = #tpu.dot_dimension_numbers<[1], [0], [0], [1], [0, 0, 1, 1], [], []>} : vector<16x32xbf16>, vector<32x64xbf16>, vector<16x64xf32> -> vector<16x64xf32>
    %c1_120 = arith.constant 1 : index
    %c0_121 = arith.constant 0 : index
    %c0_122 = arith.constant 0 : index
    %154 = vector.load %arg21[%c1_120, %c0_121, %c0_122] : memref<2x1x64xf32, #tpu.memory_space<vmem>>, vector<1x1x64xf32>
    %155 = vector.shape_cast %154 : vector<1x1x64xf32> to vector<1x64xf32>
    %156 = vector.broadcast %155 : vector<1x64xf32> to vector<16x64xf32>
    %157 = arith.addf %153, %156 : vector<16x64xf32>
    %cst_123 = arith.constant 0.000000e+00 : f32
    %158 = vector.broadcast %cst_123 : f32 to vector<16x64xf32>
    %159 = arith.maximumf %157, %158 : vector<16x64xf32>
    %c1_124 = arith.constant 1 : index
    %c0_125 = arith.constant 0 : index
    %c0_126 = arith.constant 0 : index
    %160 = vector.load %arg22[%c1_124, %c0_125, %c0_126] : memref<2x64x32xbf16, #tpu.memory_space<vmem>>, vector<1x64x32xbf16>
    %161 = vector.shape_cast %160 : vector<1x64x32xbf16> to vector<64x32xbf16>
    %162 = arith.truncf %159 : vector<16x64xf32> to vector<16x64xbf16>
    %cst_127 = arith.constant dense<0.000000e+00> : vector<16x32xf32>
    %163 = tpu.matmul %162, %161, %cst_127 {dimension_numbers = #tpu.dot_dimension_numbers<[1], [0], [0], [1], [0, 0, 1, 1], [], []>} : vector<16x64xbf16>, vector<64x32xbf16>, vector<16x32xf32> -> vector<16x32xf32>
    %c1_128 = arith.constant 1 : index
    %c0_129 = arith.constant 0 : index
    %c0_130 = arith.constant 0 : index
    %164 = vector.load %arg23[%c1_128, %c0_129, %c0_130] : memref<2x1x32xf32, #tpu.memory_space<vmem>>, vector<1x1x32xf32>
    %165 = vector.shape_cast %164 : vector<1x1x32xf32> to vector<1x32xf32>
    %166 = vector.broadcast %165 : vector<1x32xf32> to vector<16x32xf32>
    %167 = arith.addf %163, %166 : vector<16x32xf32>
    %cst_131 = arith.constant 0.000000e+00 : f32
    %168 = vector.broadcast %cst_131 : f32 to vector<16x32xf32>
    %169 = arith.maximumf %167, %168 : vector<16x32xf32>
    %c1_132 = arith.constant 1 : index
    %c0_133 = arith.constant 0 : index
    %c0_134 = arith.constant 0 : index
    %170 = vector.load %arg24[%c1_132, %c0_133, %c0_134] : memref<2x32x32xbf16, #tpu.memory_space<vmem>>, vector<1x32x32xbf16>
    %171 = vector.shape_cast %170 : vector<1x32x32xbf16> to vector<32x32xbf16>
    %172 = arith.truncf %169 : vector<16x32xf32> to vector<16x32xbf16>
    %cst_135 = arith.constant dense<0.000000e+00> : vector<16x32xf32>
    %173 = tpu.matmul %172, %171, %cst_135 {dimension_numbers = #tpu.dot_dimension_numbers<[1], [0], [0], [1], [0, 0, 1, 1], [], []>} : vector<16x32xbf16>, vector<32x32xbf16>, vector<16x32xf32> -> vector<16x32xf32>
    %c1_136 = arith.constant 1 : index
    %c0_137 = arith.constant 0 : index
    %c0_138 = arith.constant 0 : index
    %174 = vector.load %arg25[%c1_136, %c0_137, %c0_138] : memref<2x1x32xf32, #tpu.memory_space<vmem>>, vector<1x1x32xf32>
    %175 = vector.shape_cast %174 : vector<1x1x32xf32> to vector<1x32xf32>
    %176 = vector.broadcast %175 : vector<1x32xf32> to vector<16x32xf32>
    %177 = arith.addf %173, %176 : vector<16x32xf32>
    %cst_139 = arith.constant 0.000000e+00 : f32
    %178 = vector.broadcast %cst_139 : f32 to vector<16x32xf32>
    %179 = arith.maximumf %177, %178 : vector<16x32xf32>
    %c0_140 = arith.constant 0 : index
    %c0_141 = arith.constant 0 : index
    %180 = vector.load %arg6[%c0_140, %c0_141] : memref<32x16xbf16, #tpu.memory_space<vmem>>, vector<32x16xbf16>
    %181 = arith.truncf %179 : vector<16x32xf32> to vector<16x32xbf16>
    %cst_142 = arith.constant dense<0.000000e+00> : vector<32x32xf32>
    %182 = tpu.matmul %180, %181, %cst_142 {dimension_numbers = #tpu.dot_dimension_numbers<[1], [0], [0], [1], [0, 0, 1, 1], [], []>} : vector<32x16xbf16>, vector<16x32xbf16>, vector<32x32xf32> -> vector<32x32xf32>
    %183 = vector.broadcast %18 : vector<32x1xf32> to vector<32x32xf32>
    %184 = arith.mulf %183, %182 : vector<32x32xf32>
    %185 = arith.addf %143, %184 : vector<32x32xf32>
    %c0_143 = arith.constant 0 : index
    %c0_144 = arith.constant 0 : index
    %186 = vector.load %arg28[%c0_143, %c0_144] : memref<32x32xbf16, #tpu.memory_space<vmem>>, vector<32x32xbf16>
    %187 = arith.truncf %185 : vector<32x32xf32> to vector<32x32xbf16>
    %cst_145 = arith.constant dense<0.000000e+00> : vector<32x32xf32>
    %188 = tpu.matmul %187, %186, %cst_145 {dimension_numbers = #tpu.dot_dimension_numbers<[1], [0], [0], [1], [0, 0, 1, 1], [], []>} : vector<32x32xbf16>, vector<32x32xbf16>, vector<32x32xf32> -> vector<32x32xf32>
    %c0_146 = arith.constant 0 : index
    %c0_147 = arith.constant 0 : index
    %189 = vector.load %arg29[%c0_146, %c0_147] : memref<1x32xf32, #tpu.memory_space<vmem>>, vector<1x32xf32>
    %190 = vector.broadcast %189 : vector<1x32xf32> to vector<32x32xf32>
    %191 = arith.addf %188, %190 : vector<32x32xf32>
    %cst_148 = arith.constant 0.000000e+00 : f32
    %192 = vector.broadcast %cst_148 : f32 to vector<32x32xf32>
    %193 = arith.maximumf %191, %192 : vector<32x32xf32>
    %c0_149 = arith.constant 0 : index
    %c0_150 = arith.constant 0 : index
    %194 = vector.load %arg30[%c0_149, %c0_150] : memref<32x32xbf16, #tpu.memory_space<vmem>>, vector<32x32xbf16>
    %195 = arith.truncf %193 : vector<32x32xf32> to vector<32x32xbf16>
    %cst_151 = arith.constant dense<0.000000e+00> : vector<32x32xf32>
    %196 = tpu.matmul %195, %194, %cst_151 {dimension_numbers = #tpu.dot_dimension_numbers<[1], [0], [0], [1], [0, 0, 1, 1], [], []>} : vector<32x32xbf16>, vector<32x32xbf16>, vector<32x32xf32> -> vector<32x32xf32>
    %c0_152 = arith.constant 0 : index
    %c0_153 = arith.constant 0 : index
    %197 = vector.load %arg31[%c0_152, %c0_153] : memref<1x32xf32, #tpu.memory_space<vmem>>, vector<1x32xf32>
    %198 = vector.broadcast %197 : vector<1x32xf32> to vector<32x32xf32>
    %199 = arith.addf %196, %198 : vector<32x32xf32>
    %cst_154 = arith.constant 0.000000e+00 : f32
    %200 = vector.broadcast %cst_154 : f32 to vector<32x32xf32>
    %201 = arith.maximumf %199, %200 : vector<32x32xf32>
    %c0_155 = arith.constant 0 : index
    %c0_156 = arith.constant 0 : index
    %202 = vector.load %arg32[%c0_155, %c0_156] : memref<32x8xbf16, #tpu.memory_space<vmem>>, vector<32x8xbf16>
    %203 = arith.truncf %201 : vector<32x32xf32> to vector<32x32xbf16>
    %cst_157 = arith.constant dense<0.000000e+00> : vector<32x8xf32>
    %204 = tpu.matmul %203, %202, %cst_157 {dimension_numbers = #tpu.dot_dimension_numbers<[1], [0], [0], [1], [0, 0, 1, 1], [], []>} : vector<32x32xbf16>, vector<32x8xbf16>, vector<32x8xf32> -> vector<32x8xf32>
    %c0_158 = arith.constant 0 : index
    %c0_159 = arith.constant 0 : index
    %205 = vector.load %arg33[%c0_158, %c0_159] : memref<1x8xf32, #tpu.memory_space<vmem>>, vector<1x8xf32>
    %206 = vector.broadcast %205 : vector<1x8xf32> to vector<32x8xf32>
    %207 = arith.addf %204, %206 : vector<32x8xf32>
    %cst_160 = arith.constant 0.000000e+00 : f32
    %208 = vector.broadcast %cst_160 : f32 to vector<32x8xf32>
    %209 = arith.maximumf %207, %208 : vector<32x8xf32>
    %c0_161 = arith.constant 0 : index
    %c0_162 = arith.constant 0 : index
    %210 = vector.load %arg34[%c0_161, %c0_162] : memref<8x128xbf16, #tpu.memory_space<vmem>>, vector<8x128xbf16>
    %211 = arith.truncf %209 : vector<32x8xf32> to vector<32x8xbf16>
    %cst_163 = arith.constant dense<0.000000e+00> : vector<32x128xf32>
    %212 = tpu.matmul %211, %210, %cst_163 {dimension_numbers = #tpu.dot_dimension_numbers<[1], [0], [0], [1], [0, 0, 1, 1], [], []>} : vector<32x8xbf16>, vector<8x128xbf16>, vector<32x128xf32> -> vector<32x128xf32>
    %c0_164 = arith.constant 0 : index
    %c0_165 = arith.constant 0 : index
    %213 = vector.load %arg35[%c0_164, %c0_165] : memref<1x128xf32, #tpu.memory_space<vmem>>, vector<1x128xf32>
    %214 = vector.broadcast %213 : vector<1x128xf32> to vector<32x128xf32>
    %215 = arith.addf %212, %214 : vector<32x128xf32>
    %c0_166 = arith.constant 0 : index
    %c0_167 = arith.constant 0 : index
    %216 = vector.load %arg36[%c0_166, %c0_167] : memref<32x128xf32, #tpu.memory_space<vmem>>, vector<32x128xf32>
    tpu.vector_store %arg36[%c0_166, %c0_167], %215 {strides = array<i32>} : memref<32x128xf32, #tpu.memory_space<vmem>>, vector<32x128xf32>,
    return
  }
}

</mosaic_0001>

<bundles_post_ra>
// kernel: tpu_custom_call.1
= control target key start
LH: loop header
LB: loop body
LE: loop exit
PB: predicated region body
PF: predicated region fallthrough
CT: control target
= control target key end

     0   :  { %s1993_s6 = smov 1   ;;  %s1994_s10 = smov 2   ;;  %s2459_s0 = inlined_call_operand.smem [shape: u32[37], index: -1, kind: input, shape index: {}] }
   0x1   :  { %s2042_s5 = sld [smem:[%s2459_s0]]   ;;  %s1995_s14 = smov 3  }
   0x2   :  { %s2047_s9 = sld [smem:[%s2459_s0 + %s1993_s6]]   ;;  %s1996_s18 = smov 4  }
   0x3   :  { %s2052_s13 = sld [smem:[%s2459_s0 + %s1994_s10]]   ;;  %s1997_s22 = smov 5  }
   0x4   :  { %s2057_s17 = sld [smem:[%s2459_s0 + %s1995_s14]]   ;;  %s1998_s26 = smov 6  }
   0x5   :  { %s2062_s21 = sld [smem:[%s2459_s0 + %s1996_s18]]   ;;  %s1999_s30 = smov 7  }
   0x6   :  { %s2067_s25 = sld [smem:[%s2459_s0 + %s1997_s22]]   ;;  %s2000_s4 = smov 8  }
   0x7   :  { %s2072_s29 = sld [smem:[%s2459_s0 + %s1998_s26]]   ;;  %s2001_s10 = smov 9  }
   0x8   :  { %s2077_s3 = sld [smem:[%s2459_s0 + %s1999_s30]]   ;;  %s2002_s15 = smov 10  }
   0x9   :  { %s2082_s8 = sld [smem:[%s2459_s0 + %s2000_s4]]   ;;  %s2003_s20 = smov 11  }
   0xa   :  { %s2087_s14 = sld [smem:[%s2459_s0 + %s2001_s10]]   ;;  %s2004_s26 = smov 12  }
   0xb   :  { %s2092_s19 = sld [smem:[%s2459_s0 + %s2002_s15]]   ;;  %s2005_s1 = smov 13  }
   0xc   :  { %s2097_s24 = sld [smem:[%s2459_s0 + %s2003_s20]]   ;;  %s2006_s7 = smov 14  }
   0xd   :  { %2475 = sst [smem:[#allocation5_spill]] %s2072_s29  ;;  %s2007_s15 = smov 15  }
   0xe   :  { %2476 = sst [smem:[#allocation6_spill]] %s2077_s3  ;;  %s2008_s22 = smov 16  }
   0xf   :  { %s2102_s30 = sld [smem:[%s2459_s0 + %s2004_s26]]   ;;  %s2009_s28 = smov 17  }
  0x10   :  { %2477 = sst [smem:[#allocation7_spill]] %s2087_s14 }
  0x11   :  { %s2107_s6 = sld [smem:[%s2459_s0 + %s2005_s1]]  }
  0x12   :  { %s2112_s12 = sld [smem:[%s2459_s0 + %s2006_s7]]   ;;  %s2010_s7 = smov 18  }
  0x13   :  { %s2117_s20 = sld [smem:[%s2459_s0 + %s2007_s15]]   ;;  %s2011_s15 = smov 19  }
  0x14   :  { %s2122_s27 = sld [smem:[%s2459_s0 + %s2008_s22]]   ;;  %s2012_s22 = smov 20  }
  0x15   :  { %s2127_s4 = sld [smem:[%s2459_s0 + %s2009_s28]]   ;;  %s2013_s28 = smov 21  }
  0x16   :  { %s2132_s3 = sld [smem:[%s2459_s0 + %s2010_s7]]   ;;  %s2014_s7 = smov 22  }
  0x17   :  { %s2137_s29 = sld [smem:[%s2459_s0 + %s2011_s15]]   ;;  %s2015_s15 = smov 23  }
  0x18   :  { %s2142_s14 = sld [smem:[%s2459_s0 + %s2012_s22]]   ;;  %s2016_s22 = smov 24  }
  0x1b   :  { %2478 = sst [smem:[#allocation8_spill]] %s2127_s4 }
  0x1c   :  { %2479 = sst [smem:[#allocation9_spill]] %s2132_s3 }
  0x1d   :  { %2480 = sst [smem:[#allocation10_spill]] %s2137_s29 }
  0x1e   :  { %2481 = sst [smem:[#allocation11_spill]] %s2142_s14 }
  0x1f   :  { %s2147_s4 = sld [smem:[%s2459_s0 + %s2013_s28]]   ;;  %s2017_s28 = smov 25  }
  0x20   :  { %s2152_s3 = sld [smem:[%s2459_s0 + %s2014_s7]]   ;;  %s2018_s7 = smov 26  }
  0x21   :  { %s2157_s29 = sld [smem:[%s2459_s0 + %s2015_s15]]   ;;  %s2019_s15 = smov 27  }
  0x22   :  { %s2162_s14 = sld [smem:[%s2459_s0 + %s2016_s22]]   ;;  %s2020_s22 = smov 28  }
  0x25   :  { %2482 = sst [smem:[#allocation12_spill]] %s2147_s4 }
  0x26   :  { %2483 = sst [smem:[#allocation13_spill]] %s2152_s3 }
  0x27   :  { %2484 = sst [smem:[#allocation14_spill]] %s2157_s29 }
  0x28   :  { %2485 = sst [smem:[#allocation15_spill]] %s2162_s14 }
  0x29   :  { %s2167_s4 = sld [smem:[%s2459_s0 + %s2017_s28]]   ;;  %s2021_s28 = smov 29  }
  0x2a   :  { %s2172_s3 = sld [smem:[%s2459_s0 + %s2018_s7]]   ;;  %s2022_s7 = smov 30  }
  0x2b   :  { %s2177_s29 = sld [smem:[%s2459_s0 + %s2019_s15]]   ;;  %s2023_s15 = smov 31  }
  0x2c   :  { %s2182_s14 = sld [smem:[%s2459_s0 + %s2020_s22]]   ;;  %s2024_s22 = smov 32  }
  0x2f   :  { %2486 = sst [smem:[#allocation16_spill]] %s2167_s4 }
  0x30   :  { %2487 = sst [smem:[#allocation17_spill]] %s2172_s3 }
  0x31   :  { %2488 = sst [smem:[#allocation18_spill]] %s2177_s29 }
  0x32   :  { %2489 = sst [smem:[#allocation19_spill]] %s2182_s14 }
  0x33   :  { %s2187_s4 = sld [smem:[%s2459_s0 + %s2021_s28]]   ;;  %s2025_s28 = smov 33  }
  0x34   :  { %s2192_s3 = sld [smem:[%s2459_s0 + %s2022_s7]]   ;;  %s2026_s7 = smov 34  }
  0x35   :  { %s2197_s29 = sld [smem:[%s2459_s0 + %s2023_s15]]   ;;  %s2027_s15 = smov 35  }
  0x36   :  { %s2202_s14 = sld [smem:[%s2459_s0 + %s2024_s22]]   ;;  %s2028_s22 = smov 36  }
  0x39   :  { %2490 = sst [smem:[#allocation20_spill]] %s2187_s4 }
  0x3a   :  { %2491 = sst [smem:[#allocation21_spill]] %s2192_s3 }
  0x3b   :  { %2492 = sst [smem:[#allocation22_spill]] %s2197_s29 }
  0x3c   :  { %2493 = sst [smem:[#allocation23_spill]] %s2202_s14 }
  0x3d   :  { %s2207_s4 = sld [smem:[%s2459_s0 + %s2025_s28]]  }
  0x3e   :  { %s2212_s3 = sld [smem:[%s2459_s0 + %s2026_s7]]  }
  0x3f   :  { %s2217_s29 = sld [smem:[%s2459_s0 + %s2027_s15]]  }
  0x40   :  { %s2222_s14 = sld [smem:[%s2459_s0 + %s2028_s22]]  }
  0x41   :  { %v1853_v0 = vld [vmem:[%s2092_s19] sm:$0xff]  ;;  %vm220_vm0 = vcmask 1043456   ;;  %vm178_vm1 = vcmask 130048   ;;  %v1852_v2 = vld [vmem:[%s2042_s5 + $0x8] sm:$0xff]  ;;  %vm216_vm2 = vcmask 64512  }
  0x42   :  { %v1851_v1 = vld [vmem:[%s2042_s5] sm:$0xff]  ;;  %192 = vmatpush.bf16.msra.mxu0 %v1853_v0  ;;  %1905 = vmatpush.bf16.msra.mxu1 %v1853_v0 }
  0x43   :  { %v246_v3 = vld [vmem:[%s2112_s12] sm:$0xf] }
  0x44   :  { %v284_v4 = vsel %vm220_vm0, %v246_v3, 0  ;;  %v1855_v5 = vld [vmem:[%s2052_s13] sm:$0xff] }
  0x45   :  { %293 = vmatpush.bf16.msra.mxu2 %v284_v4  ;;  %1564 = vmatmul.msk.bf16.vlgmr.msra.gmra.mxu0 %vm178_vm1, %v1851_v1 }
  0x46   :  { %1565 = vmatmul.msk.bf16.vlgmr.msra.gmra.mxu1 %vm178_vm1, %v1852_v2 }
  0x48   :  { %1587 = vmatmul.msk.bf16.vlgmr.msra.gmra.mxu2 %vm216_vm2, %v1855_v5 }
  0x49   :  { %78 = vsyncpa [#allocation3], 0  ;;  %v1856_v6 = vld [vmem:[%s2052_s13 + $0x8] sm:$0xff]  ;;  %v1857_v7 = vld [vmem:[%s2052_s13 + $0x10] sm:$0xff]  ;;  %vm351_vm3 = vcmask 261120   ;;  %v2029_v27 = vmov 0  }
  0x4a   :  { %v1858_v8 = vld [vmem:[%s2052_s13 + $0x18] sm:$0xff]  ;;  %v1949_v11 = vld [vmem:[%s2097_s24] ss:$0 sm:$0xff]  ;;  %v2258_v21 = vld [vmem:[%s2057_s17 + $0x8] sm:$0xff]  ;;  %1948 = vset.pattern.permute.xlu1 %v2029_v27  ;;  %1947 = vset.pattern.permute.xlu0 %v2029_v27  ;;  %s2030_s0 = smov 96   ;;  %vm419_vm4 = vcmask 523264  }
  0x4b   :  { %v2253_v20 = vld [vmem:[%s2057_s17] sm:$0xff]  ;;  %v2263_v24 = vld [vmem:[%s2057_s17 + $0x10] sm:$0xff]  ;;  %v318_v29 = vld [vmem:[%s2082_s8 + $0x18] sm:$0xff]  ;;  %s2494_s5 = sld [smem:[#allocation9_spill]]  ;;  %s1504_s11 = sshll.u32 %s2222_s14, 4  ;;  %s1505_s11 = int_to_ptr.hbm [resolvable:$true] %s1504_s11 }
  0x4c   :  { %v317_v26 = vld [vmem:[%s2082_s8 + $0x10] sm:$0xff]  ;;  %v315_v30 = vld [vmem:[%s2082_s8] sm:$0xff]  ;;  %v2271_v31 = vld [vmem:[%s2057_s17 + $0x18] sm:$0xff]  ;;  %s2496_s13 = sld [smem:[#allocation8_spill]]  ;;  %s1983_s16 = scalar_lea.hbm %s2222_s14, 32 }
  0x4d   :  { %788 = vperm.xlu1 %1948, %v317_v26   ;;  %778 = vperm.xlu0 %1947, %v315_v30   ;;  %v1950_v33 = vld [vmem:[%s2117_s20] ss:$0 sm:$0xff]  ;;  %v316_v43 = vld [vmem:[%s2082_s8 + $0x8] sm:$0xff]  ;;  %s2497_s17 = sld [smem:[#allocation13_spill]] }
  0x4e   :  { %v206_v54 = vld [vmem:[%s2102_s30] sm:$0xf]  ;;  %s2500_s8 = sld [smem:[#allocation14_spill]] }
  0x4f   :  { %v222_v55 = vsel %vm220_vm0, %v206_v54, 0  ;;  %v1854_v56 = vld [vmem:[%s2047_s9] sm:$0xff]  ;;  %s2495_s9 = sld [smem:[#allocation11_spill]] }
  0x50   :  { %231 = vmatpush.bf16.msrb.mxu1 %v222_v55  ;;  %s2501_s19 = sld [smem:[#allocation7_spill]] }
  0x51   :  { %s2502_s24 = sld [smem:[#allocation16_spill]] }
  0x52   :  { %s2503_s30 = sld [smem:[#allocation5_spill]] }
  0x53   :  { %s2505_s12 = sld [smem:[#allocation10_spill]] }
  0x54   :  { %s2506_s20 = sld [smem:[#allocation18_spill]] }
  0x55   :  { %793 = vperm.xlu1 %1948, %v318_v29   ;;  %783 = vperm.xlu0 %1947, %v316_v43   ;;  %v2301_v43 = vld [vmem:[%s2067_s25] sm:$0xff]  ;;  %s2499_s25 = sld [smem:[#allocation15_spill]] }
  0x56   :  { %1570 = vmatmul.msk.bf16.vlgmr.msrb.gmra.mxu1 %vm216_vm2, %v1854_v56  ;;  %s2507_s28 = sld [smem:[#allocation6_spill]] }
  0x57   :  { %s2509_s1 = sld [smem:[#allocation21_spill]] }
  0x58   :  { %1588 = vmatmul.msk.bf16.gmra.mxu2 %vm216_vm2, %v1856_v6  ;;  %s2510_s2 = sld [smem:[#allocation20_spill]] }
  0x59   :  { %s2511_s7 = sld [smem:[#allocation23_spill]] }
  0x5a   :  { %s2512_s10 = sld [smem:[#allocation22_spill]] }
  0x68   :  { %1589 = vmatmul.msk.bf16.gmra.mxu2 %vm216_vm2, %v1857_v7 }
  0x78   :  { %1590 = vmatmul.msk.bf16.gmra.mxu2 %vm216_vm2, %v1858_v8 }
  0xc2   :  { %v194_v9 = vpop.f32.mrf.mxu0 }
  0xc3   :  { %v199_v10 = vpop.f32.mrf.mxu1  ;;  %v2248_v18 = vadd.f32 %v1949_v11, %v194_v9 }
  0xc4   :  { %v2240_v14 = vadd.f32 %v1949_v11, %v199_v10 }
  0xca   :  { %v196_v12 = vpop.f32.mrf.mxu0 }
  0xcb   :  { %v201_v13 = vpop.f32.mrf.mxu1  ;;  %v2244_v16 = vadd.f32 %v1949_v11, %v196_v12  ;;  %v295_v22 = vpop.f32.mrf.mxu2 }
  0xcc   :  { %v2242_v15 = vadd.f32 %v1949_v11, %v201_v13  ;;  %v296_v36 = vadd.f32 %v1950_v33, %v295_v22  ;;  %v2282_v13 = vld [vmem:[%s2062_s21] sm:$0xff] }
  0xcd   :  { %v329_v19 = vpack.c.bf16 %v2244_v16, %v2248_v18  ;;  %v1865_v22 = vld [vmem:[%s2122_s27] sm:$0xff] }
  0xce   :  { %v330_v17 = vpack.c.bf16 %v2242_v15, %v2240_v14 }
  0xd0   :  { %370 = vmatpush.bf16.msra.mxu3 %v330_v17  ;;  %v2287_v17 = vld [vmem:[%s2062_s21 + $0x8] sm:$0xff]  ;;  %s2498_s21 = sld [smem:[#allocation12_spill]] }
  0xd3   :  { %v297_v23 = vpop.f32.mrf.mxu2 }
  0xd4   :  { %371 = vmatpush.bf16.msra.mxu3 %v329_v19  ;;  %v298_v42 = vadd.f32 %v1950_v33, %v297_v23  ;;  %v1866_v19 = vld [vmem:[%s2122_s27 + $0x8] sm:$0xff]  ;;  %v233_v23 = vpop.f32.mrf.mxu1 }
  0xd5   :  { %487 = vmatpush.bf16.msrb.mxu0 %v1866_v19 }
  0xd7   :  { %1607 = vmatmul.msk.bf16.vlgmr.msra.gmra.mxu3 %vm351_vm3, %v2253_v20 }
  0xd9   :  { %488 = vmatpush.bf16.msrb.mxu0 %v1865_v22 }
  0xdb   :  { %v300_v25 = vpop.f32.mrf.mxu2 }
  0xdc   :  { %v301_v41 = vadd.f32 %v1950_v33, %v300_v25  ;;  %v1951_v25 = vld [vmem:[%s2107_s6] ss:$0 sm:$0xff]  ;;  %v235_v27 = vpop.f32.mrf.mxu1  ;;  %s2504_s6 = sld [smem:[#allocation17_spill]] }
  0xdd   :  { %v234_v26 = vadd.f32 %v1951_v25, %v233_v23 }
  0xe3   :  { %v302_v28 = vpop.f32.mrf.mxu2 }
  0xe4   :  { %v303_v45 = vadd.f32 %v1950_v33, %v302_v28  ;;  %v236_v28 = vadd.f32 %v1951_v25, %v235_v27  ;;  %v1879_v27 = vld [vmem:[%s2499_s25 + $0x8] sm:$0xff] }
  0xe6   :  { %v573_v29 = vpack.c.bf16 %v236_v28, %v234_v26 }
  0xe7   :  { %1608 = vmatmul.msk.bf16.gmra.mxu3 %vm351_vm3, %v2258_v21 }
  0xe8   :  { %589 = vmatpush.bf16.msra.mxu0 %v573_v29 }
  0xeb   :  { %v305_v32 = vpop.f32.mrf.mxu2 }
  0xec   :  { %v306_v44 = vadd.f32 %v1950_v33, %v305_v32  ;;  %v445_v32 = vmul.f32 1.1, %v2248_v18 }
  0xee   :  { %911 = vrot.lane.b32.xlu0 %v306_v44, %s2030_s0 }
  0xf3   :  { %v307_v34 = vpop.f32.mrf.mxu2 }
  0xf4   :  { %v308_v35 = vadd.f32 %v1950_v33, %v307_v34 }
  0xf6   :  { %913 = vrot.lane.b32.xlu1 %v308_v35, %s2030_s0  ;;  %909 = vrot.lane.b32.xlu0 %v303_v45, %s2030_s0 }
  0xf7   :  { %1609 = vmatmul.msk.bf16.gmra.mxu3 %vm351_vm3, %v2263_v24 }
  0xfb   :  { %v310_v37 = vpop.f32.mrf.mxu2 }
  0xfc   :  { %v311_v38 = vadd.f32 %v1950_v33, %v310_v37 }
  0xfe   :  { %915 = vrot.lane.b32.xlu2 %v311_v38, %s2030_s0  ;;  %903 = vrot.lane.b32.xlu1 %v296_v36, %s2030_s0 }
 0x103   :  { %v312_v39 = vpop.f32.mrf.mxu2 }
 0x104   :  { %v313_v40 = vadd.f32 %v1950_v33, %v312_v39  ;;  %v446_v33 = vmul.f32 1.1, %v2244_v16  ;;  %v447_v39 = vmul.f32 1.1, %v2240_v14  ;;  %v1868_v14 = vld [vmem:[%s2494_s5 + $0x8] sm:$0xff] }
 0x106   :  { %917 = vrot.lane.b32.xlu2 %v313_v40, %s2030_s0 }
 0x107   :  { %1610 = vmatmul.msk.bf16.gmra.mxu3 %vm351_vm3, %v2271_v31 }
 0x10e   :  { %907 = vrot.lane.b32.xlu2 %v301_v41, %s2030_s0 }
 0x116   :  { %905 = vrot.lane.b32.xlu2 %v298_v42, %s2030_s0 }
 0x15a   :  { %v373_v46 = vpop.f32.mrf.mxu3 }
 0x15b   :  { %v374_v47 = vadd.f32 %v373_v46, %v296_v36 }
 0x15d   :  { %v393_v50 = vmax.f32 %v374_v47, 0.0  ;;  %v1873_v47 = vld [vmem:[%s2495_s9 + $0x8] sm:$0xff] }
 0x15e   :  { %630 = vmatpush.bf16.msrb.mxu2 %v1873_v47 }
 0x162   :  { %v375_v48 = vpop.f32.mrf.mxu3 }
 0x163   :  { %v376_v49 = vadd.f32 %v375_v48, %v298_v42  ;;  %v1952_v48 = vld [vmem:[%s2496_s13] ss:$0 sm:$0xff] }
 0x165   :  { %v394_v51 = vmax.f32 %v376_v49, 0.0 }
 0x167   :  { %v405_v52 = vpack.c.bf16 %v394_v51, %v393_v50  ;;  %v1872_v51 = vld [vmem:[%s2495_s9] sm:$0xff] }
 0x168   :  { %631 = vmatpush.bf16.msrb.mxu2 %v1872_v51 }
 0x16a   :  { %v378_v53 = vpop.f32.mrf.mxu3 }
 0x16b   :  { %v379_v7 = vadd.f32 %v378_v53, %v301_v41 }
 0x16d   :  { %v395_v11 = vmax.f32 %v379_v7, 0.0  ;;  %v1876_v7 = vld [vmem:[%s2497_s17 + $0x10] sm:$0xff] }
 0x172   :  { %v380_v57 = vpop.f32.mrf.mxu3 }
 0x173   :  { %v381_v4 = vadd.f32 %v380_v57, %v303_v45  ;;  %v1869_v45 = vld [vmem:[%s2494_s5 + $0x10] sm:$0xff] }
 0x175   :  { %v396_v9 = vmax.f32 %v381_v4, 0.0 }
 0x177   :  { %v406_v12 = vpack.c.bf16 %v396_v9, %v395_v11  ;;  %v1874_v9 = vld [vmem:[%s2497_s17] sm:$0xff] }
 0x178   :  { %v1954_v11 = vld [vmem:[%s2498_s21] ss:$0 sm:$0xff] }
 0x17a   :  { %v383_v58 = vpop.f32.mrf.mxu3 }
 0x17b   :  { %v384_v1 = vadd.f32 %v383_v58, %v306_v44  ;;  %v1870_v44 = vld [vmem:[%s2494_s5 + $0x18] sm:$0xff] }
 0x17d   :  { %v397_v8 = vmax.f32 %v384_v1, 0.0  ;;  %v597_v1 = vmul.f32 1.05, %v236_v28  ;;  %v1878_v28 = vld [vmem:[%s2499_s25] sm:$0xff] }
 0x182   :  { %v385_v59 = vpop.f32.mrf.mxu3 }
 0x183   :  { %v386_v63 = vadd.f32 %v385_v59, %v308_v35 }
 0x185   :  { %v398_v5 = vmax.f32 %v386_v63, 0.0 }
 0x187   :  { %v407_v10 = vpack.c.bf16 %v398_v5, %v397_v8  ;;  %v1875_v8 = vld [vmem:[%s2497_s17 + $0x8] sm:$0xff] }
 0x18a   :  { %v388_v60 = vpop.f32.mrf.mxu3 }
 0x18b   :  { %v389_v61 = vadd.f32 %v388_v60, %v311_v38 }
 0x18d   :  { %v399_v2 = vmax.f32 %v389_v61, 0.0 }
 0x192   :  { %v390_v62 = vpop.f32.mrf.mxu3 }
 0x193   :  { %v391_v0 = vadd.f32 %v390_v62, %v313_v40  ;;  %v448_v40 = vmul.f32 1.1, %v2242_v15  ;;  %v1867_v15 = vld [vmem:[%s2494_s5] sm:$0xff] }
 0x195   :  { %v400_v3 = vmax.f32 %v391_v0, 0.0  ;;  %v596_v0 = vmul.f32 1.05, %v234_v26 }
 0x197   :  { %v408_v6 = vpack.c.bf16 %v400_v3, %v399_v2 }
 0x199   :  { %430 = vmatpush.bf16.msra.mxu1 %v408_v6  ;;  %v1877_v6 = vld [vmem:[%s2497_s17 + $0x18] sm:$0xff] }
 0x19a   :  { %684 = vmatpush.bf16.msrb.mxu3 %v1877_v6 }
 0x19d   :  { %431 = vmatpush.bf16.msra.mxu1 %v407_v10 }
 0x19e   :  { %685 = vmatpush.bf16.msrb.mxu3 %v1876_v7 }
 0x1a1   :  { %432 = vmatpush.bf16.msra.mxu1 %v406_v12 }
 0x1a2   :  { %686 = vmatpush.bf16.msrb.mxu3 %v1875_v8 }
 0x1a5   :  { %433 = vmatpush.bf16.msra.mxu1 %v405_v52 }
 0x1a6   :  { %687 = vmatpush.bf16.msrb.mxu3 %v1874_v9 }
 0x1a8   :  { %1619 = vmatmul.msk.bf16.vlgmr.msra.gmra.mxu1 %vm419_vm4, %v2282_v13 }
 0x1a9   :  { %552 = vmatpush.bf16.msrb.mxu1 %v1870_v44 }
 0x1ad   :  { %553 = vmatpush.bf16.msrb.mxu1 %v1869_v45 }
 0x1b1   :  { %554 = vmatpush.bf16.msrb.mxu1 %v1868_v14 }
 0x1b5   :  { %555 = vmatpush.bf16.msrb.mxu1 %v1867_v15  ;;  %v2339_v15 = vld [vmem:[%s2503_s30] sm:$0xff] }
 0x1b8   :  { %1620 = vmatmul.msk.bf16.gmra.mxu1 %vm419_vm4, %v2287_v17 }
 0x225   :  { %v435_v30 = vpop.f32.mrf.mxu1 }
 0x226   :  { %v449_v35 = vadd.f32 %v445_v32, %v435_v30  ;;  %v1955_v30 = vld [vmem:[%s2500_s8] ss:$0 sm:$0xff] }
 0x22d   :  { %v437_v34 = vpop.f32.mrf.mxu1 }
 0x22e   :  { %v450_v36 = vadd.f32 %v446_v33, %v437_v34 }
 0x230   :  { %v457_v37 = vpack.c.bf16 %v450_v36, %v449_v35 }
 0x232   :  { %1629 = vmatmul.msk.bf16.vlgmr.msrb.gmra.mxu0 %vm351_vm3, %v457_v37 }
 0x233   :  { %726 = vmatpush.bf16.msrb.mxu0 %v1879_v27 }
 0x235   :  { %v440_v38 = vpop.f32.mrf.mxu1 }
 0x236   :  { %v451_v18 = vadd.f32 %v447_v39, %v440_v38  ;;  %v319_v38 = vld [vmem:[%s2501_s19] sm:$0xff] }
 0x237   :  { %727 = vmatpush.bf16.msrb.mxu0 %v1878_v28  ;;  %883 = vperm.xlu0 %1947, %v319_v38  }
 0x23d   :  { %v442_v41 = vpop.f32.mrf.mxu1 }
 0x23e   :  { %v452_v16 = vadd.f32 %v448_v40, %v442_v41  ;;  %v320_v40 = vld [vmem:[%s2501_s19 + $0x8] sm:$0xff]  ;;  %v1956_v41 = vld [vmem:[%s2502_s24] ss:$0 sm:$0xff] }
 0x23f   :  { %888 = vperm.xlu1 %1948, %v320_v40  }
 0x240   :  { %v458_v42 = vpack.c.bf16 %v452_v16, %v451_v18 }
 0x242   :  { %1630 = vmatmul.msk.bf16.gmra.mxu0 %vm351_vm3, %v458_v42 }
 0x252   :  { %1653 = vmatmul.msk.bf16.vlgmr.msra.gmra.mxu0 %vm178_vm1, %v2301_v43 }
 0x2af   :  { %v490_v46 = vpop.f32.mrf.mxu0 }
 0x2b0   :  { %v491_v49 = vadd.f32 %v1952_v48, %v490_v46  ;;  %v2344_v46 = vld [vmem:[%s2503_s30 + $0x8] sm:$0xff] }
 0x2b2   :  { %v500_v53 = vmax.f32 %v491_v49, 0.0  ;;  %v1883_v49 = vld [vmem:[%s2504_s6 + $0x8] sm:$0xff] }
 0x2b3   :  { %838 = vmatpush.bf16.msra.mxu2 %v1883_v49 }
 0x2b7   :  { %v492_v50 = vpop.f32.mrf.mxu0 }
 0x2b8   :  { %v493_v52 = vadd.f32 %v1952_v48, %v492_v50  ;;  %v1882_v50 = vld [vmem:[%s2504_s6] sm:$0xff] }
 0x2b9   :  { %839 = vmatpush.bf16.msra.mxu2 %v1882_v50 }
 0x2ba   :  { %v501_v54 = vmax.f32 %v493_v52, 0.0 }
 0x2bc   :  { %v512_v55 = vpack.c.bf16 %v501_v54, %v500_v53  ;;  %v2350_v53 = vpop.permute.xlu0 %778 }
 0x2be   :  { %1647 = vmatmul.msk.bf16.vlgmr.msrb.gmra.mxu1 %vm419_vm4, %v512_v55  ;;  %v1953_v55 = vld [vmem:[%s2505_s12] ss:$0 sm:$0xff] }
 0x2bf   :  { %v495_v56 = vpop.f32.mrf.mxu0 }
 0x2c0   :  { %v496_v57 = vadd.f32 %v1952_v48, %v495_v56 }
 0x2c2   :  { %v502_v60 = vmax.f32 %v496_v57, 0.0 }
 0x2c7   :  { %v497_v58 = vpop.f32.mrf.mxu0 }
 0x2c8   :  { %v498_v59 = vadd.f32 %v1952_v48, %v497_v58 }
 0x2ca   :  { %v503_v61 = vmax.f32 %v498_v59, 0.0  ;;  %v2354_v59 = vpop.permute.xlu0 %783 }
 0x2cc   :  { %v513_v62 = vpack.c.bf16 %v503_v61, %v502_v60 }
 0x2ce   :  { %1648 = vmatmul.msk.bf16.gmra.mxu1 %vm419_vm4, %v513_v62 }
 0x2cf   :  { %v591_v63 = vpop.f32.mrf.mxu0 }
 0x2d0   :  { %v598_v3 = vadd.f32 %v596_v0, %v591_v63 }
 0x2d2   :  { %v912_v50 = vpop.permute.xlu0 %911 }
 0x2d7   :  { %v593_v2 = vpop.f32.mrf.mxu0 }
 0x2d8   :  { %v599_v4 = vadd.f32 %v597_v1, %v593_v2 }
 0x2da   :  { %v604_v5 = vpack.c.bf16 %v599_v4, %v598_v3  ;;  %v2363_v3 = vpop.permute.xlu1 %788 }
 0x2dc   :  { %1662 = vmatmul.msk.bf16.vlgmr.msrb.gmra.mxu2 %vm351_vm3, %v604_v5 }
 0x2e2   :  { %v2367_v8 = vpop.permute.xlu1 %793 }
 0x33b   :  { %v557_v47 = vpop.f32.mrf.mxu1 }
 0x33c   :  { %v558_v56 = vadd.f32 %v1953_v55, %v557_v47 }
 0x33e   :  { %v567_v61 = vmax.f32 %v558_v56, 0.0 }
 0x343   :  { %v559_v48 = vpop.f32.mrf.mxu1 }
 0x344   :  { %v560_v57 = vadd.f32 %v1953_v55, %v559_v48 }
 0x346   :  { %v568_v62 = vmax.f32 %v560_v57, 0.0 }
 0x34b   :  { %v562_v51 = vpop.f32.mrf.mxu1 }
 0x34c   :  { %v563_v5 = vadd.f32 %v1953_v55, %v562_v51 }
 0x353   :  { %v564_v52 = vpop.f32.mrf.mxu1 }
 0x354   :  { %v565_v6 = vadd.f32 %v1953_v55, %v564_v52 }
 0x35f   :  { %v633_v10 = vpop.f32.mrf.mxu2 }
 0x360   :  { %v634_v12 = vadd.f32 %v1954_v11, %v633_v10  ;;  %v569_v10 = vmax.f32 %v563_v5, 0.0 }
 0x362   :  { %v638_v23 = vmax.f32 %v634_v12, 0.0 }
 0x367   :  { %v635_v19 = vpop.f32.mrf.mxu2 }
 0x368   :  { %v636_v22 = vadd.f32 %v1954_v11, %v635_v19  ;;  %v570_v11 = vmax.f32 %v565_v6, 0.0 }
 0x36a   :  { %v639_v25 = vmax.f32 %v636_v22, 0.0 }
 0x36c   :  { %v648_v26 = vpack.c.bf16 %v639_v25, %v638_v23 }
 0x36e   :  { %1679 = vmatmul.msk.bf16.vlgmr.msrb.gmra.mxu3 %vm419_vm4, %v648_v26 }
 0x3f1   :  { %v689_v29 = vpop.f32.mrf.mxu3 }
 0x3f2   :  { %v2324_v32 = vadd.f32 %v1955_v30, %v689_v29  ;;  %v1957_v29 = vld [vmem:[%s2506_s20] ss:$0 sm:$0xff] }
 0x3f4   :  { %v694_v35 = vmax.f32 %v2324_v32, 0.0 }
 0x3f9   :  { %v691_v33 = vpop.f32.mrf.mxu3 }
 0x3fa   :  { %v2326_v34 = vadd.f32 %v1955_v30, %v691_v33 }
 0x3fc   :  { %v695_v36 = vmax.f32 %v2326_v34, 0.0 }
 0x3fe   :  { %v700_v37 = vpack.c.bf16 %v695_v36, %v694_v35 }
 0x400   :  { %1688 = vmatmul.msk.bf16.vlgmr.msrb.gmra.mxu0 %vm351_vm3, %v700_v37 }
 0x47d   :  { %v729_v39 = vpop.f32.mrf.mxu0 }
 0x47e   :  { %v730_v18 = vadd.f32 %v1956_v41, %v729_v39 }
 0x480   :  { %v734_v44 = vmax.f32 %v730_v18, 0.0 }
 0x485   :  { %v731_v16 = vpop.f32.mrf.mxu0 }
 0x486   :  { %v732_v42 = vadd.f32 %v1956_v41, %v731_v16 }
 0x488   :  { %v735_v45 = vmax.f32 %v732_v42, 0.0  ;;  %v1884_v42 = vld [vmem:[%s2507_s28] sm:$0xff] }
 0x48a   :  { %v740_v14 = vpack.c.bf16 %v735_v45, %v734_v44 }
 0x48c   :  { %764 = vmatpush.bf16.msra.mxu1 %v740_v14  ;;  %v916_v14 = vpop.permute.xlu2 %915 }
 0x48f   :  { %1697 = vmatmul.msk.bf16.vlgmr.msra.gmra.mxu1 %vm178_vm1, %v2339_v15 }
 0x494   :  { %v918_v48 = vpop.permute.xlu2 %917 }
 0x49c   :  { %v908_v51 = vpop.permute.xlu2 %907 }
 0x49f   :  { %1698 = vmatmul.msk.bf16.gmra.mxu1 %vm178_vm1, %v2344_v46 }
 0x50c   :  { %v766_v54 = vpop.f32.mrf.mxu1 }
 0x50d   :  { %v796_v58 = vmul.f32 %v2350_v53, %v766_v54  ;;  %v914_v54 = vpop.permute.xlu1 %913 }
 0x50f   :  { %v2357_v0 = vadd.f32 %v796_v58, %v567_v61 }
 0x514   :  { %v768_v60 = vpop.f32.mrf.mxu1 }
 0x515   :  { %v797_v63 = vmul.f32 %v2354_v59, %v768_v60 }
 0x517   :  { %v2359_v1 = vadd.f32 %v797_v63, %v568_v62  ;;  %v910_v62 = vpop.permute.xlu0 %909 }
 0x519   :  { %v808_v2 = vpack.c.bf16 %v2359_v1, %v2357_v0 }
 0x51b   :  { %1707 = vmatmul.msk.bf16.vlgmr.msra.gmra.mxu2 %vm351_vm3, %v808_v2 }
 0x51c   :  { %v771_v4 = vpop.f32.mrf.mxu1 }
 0x51d   :  { %v798_v7 = vmul.f32 %v2363_v3, %v771_v4 }
 0x51f   :  { %v2370_v19 = vadd.f32 %v798_v7, %v569_v10  ;;  %v906_v7 = vpop.permute.xlu2 %905 }
 0x524   :  { %v773_v9 = vpop.f32.mrf.mxu1 }
 0x525   :  { %v799_v12 = vmul.f32 %v2367_v8, %v773_v9 }
 0x527   :  { %v2372_v22 = vadd.f32 %v799_v12, %v570_v11  ;;  %v904_v12 = vpop.permute.xlu1 %903 }
 0x529   :  { %v809_v23 = vpack.c.bf16 %v2372_v22, %v2370_v19 }
 0x52b   :  { %1708 = vmatmul.msk.bf16.gmra.mxu2 %vm351_vm3, %v809_v23  ;;  %933 = vmatpush.bf16.msra.mxu0 %v809_v23 }
 0x52f   :  { %934 = vmatpush.bf16.msra.mxu0 %v808_v2 }
 0x532   :  { %1714 = vmatmul.msk.bf16.vlgmr.msra.gmra.mxu0 %vm351_vm3, %v2253_v20 }
 0x542   :  { %1715 = vmatmul.msk.bf16.gmra.mxu0 %vm351_vm3, %v2258_v21 }
 0x552   :  { %1716 = vmatmul.msk.bf16.gmra.mxu0 %vm351_vm3, %v2263_v24 }
 0x562   :  { %1717 = vmatmul.msk.bf16.gmra.mxu0 %vm351_vm3, %v2271_v31 }
 0x59e   :  { %v841_v25 = vpop.f32.mrf.mxu2 }
 0x59f   :  { %v842_v39 = vadd.f32 %v1957_v29, %v841_v25 }
 0x5a1   :  { %v851_v24 = vmax.f32 %v842_v39, 0.0 }
 0x5a6   :  { %v843_v26 = vpop.f32.mrf.mxu2 }
 0x5a7   :  { %v844_v37 = vadd.f32 %v1957_v29, %v843_v26 }
 0x5a9   :  { %v852_v41 = vmax.f32 %v844_v37, 0.0  ;;  %v884_v37 = vpop.permute.xlu0 %883 }
 0x5ab   :  { %v857_v16 = vpack.c.bf16 %v852_v41, %v851_v24  ;;  %v987_v24 = vmul.f32 1.2, %v2357_v0  ;;  %v1892_v0 = vld [vmem:[%s2495_s9 + $0x18] sm:$0xff] }
 0x5ae   :  { %v846_v27 = vpop.f32.mrf.mxu2 }
 0x5af   :  { %v936_v28 = vpop.f32.mrf.mxu0  ;;  %v847_v30 = vadd.f32 %v1957_v29, %v846_v27 }
 0x5b0   :  { %v937_v23 = vadd.f32 %v936_v28, %v904_v12  ;;  %v889_v28 = vpop.permute.xlu1 %888 }
 0x5b1   :  { %v853_v40 = vmax.f32 %v847_v30, 0.0 }
 0x5b6   :  { %v848_v33 = vpop.f32.mrf.mxu2 }
 0x5b7   :  { %v849_v38 = vadd.f32 %v1957_v29, %v848_v33  ;;  %v938_v20 = vpop.f32.mrf.mxu0  ;;  %v956_v29 = vmax.f32 %v937_v23, 0.0 }
 0x5b8   :  { %v939_v9 = vadd.f32 %v938_v20, %v906_v7 }
 0x5b9   :  { %v854_v21 = vmax.f32 %v849_v38, 0.0 }
 0x5ba   :  { %v957_v26 = vmax.f32 %v939_v9, 0.0 }
 0x5bb   :  { %v858_v18 = vpack.c.bf16 %v854_v21, %v853_v40 }
 0x5bc   :  { %v964_v30 = vpack.c.bf16 %v957_v26, %v956_v29  ;;  %v1895_v26 = vld [vmem:[%s2497_s17 + $0x30] sm:$0xff]  ;;  %v1893_v29 = vld [vmem:[%s2497_s17 + $0x20] sm:$0xff] }
 0x5bd   :  { %873 = vmatpush.bf16.msra.mxu3 %v858_v18 }
 0x5bf   :  { %v941_v31 = vpop.f32.mrf.mxu0 }
 0x5c0   :  { %v942_v5 = vadd.f32 %v941_v31, %v908_v51 }
 0x5c1   :  { %874 = vmatpush.bf16.msra.mxu3 %v857_v16  ;;  %v988_v16 = vmul.f32 1.2, %v2359_v1  ;;  %v1891_v1 = vld [vmem:[%s2495_s9 + $0x10] sm:$0xff] }
 0x5c2   :  { %v958_v25 = vmax.f32 %v942_v5, 0.0 }
 0x5c4   :  { %1713 = vmatmul.msk.bf16.vlgmr.msra.gmra.mxu3 %vm351_vm3, %v1884_v42  ;;  %v990_v42 = vmul.f32 1.2, %v2372_v22 }
 0x5c7   :  { %v943_v44 = vpop.f32.mrf.mxu0 }
 0x5c8   :  { %v944_v63 = vadd.f32 %v943_v44, %v910_v62 }
 0x5ca   :  { %v959_v10 = vmax.f32 %v944_v63, 0.0 }
 0x5cc   :  { %v965_v27 = vpack.c.bf16 %v959_v10, %v958_v25  ;;  %v1896_v25 = vld [vmem:[%s2497_s17 + $0x38] sm:$0xff] }
 0x5cf   :  { %v946_v45 = vpop.f32.mrf.mxu0 }
 0x5d0   :  { %v947_v58 = vadd.f32 %v946_v45, %v912_v50 }
 0x5d2   :  { %v960_v6 = vmax.f32 %v947_v58, 0.0 }
 0x5d7   :  { %v948_v47 = vpop.f32.mrf.mxu0 }
 0x5d8   :  { %v949_v56 = vadd.f32 %v948_v47, %v914_v54  ;;  %v1890_v54 = vld [vmem:[%s2494_s5 + $0x38] sm:$0xff] }
 0x5d9   :  { %1098 = vmatpush.bf16.msrb.mxu2 %v1890_v54 }
 0x5da   :  { %v961_v2 = vmax.f32 %v949_v56, 0.0  ;;  %v1888_v56 = vld [vmem:[%s2494_s5 + $0x28] sm:$0xff] }
 0x5dc   :  { %v966_v11 = vpack.c.bf16 %v961_v2, %v960_v6 }
 0x5df   :  { %v951_v49 = vpop.f32.mrf.mxu0 }
 0x5e0   :  { %v952_v52 = vadd.f32 %v951_v49, %v916_v14 }
 0x5e2   :  { %v962_v60 = vmax.f32 %v952_v52, 0.0 }
 0x5e7   :  { %v953_v55 = vpop.f32.mrf.mxu0 }
 0x5e8   :  { %v954_v57 = vadd.f32 %v953_v55, %v918_v48  ;;  %v1889_v55 = vld [vmem:[%s2494_s5 + $0x30] sm:$0xff] }
 0x5e9   :  { %1099 = vmatpush.bf16.msrb.mxu2 %v1889_v55 }
 0x5ea   :  { %v963_v61 = vmax.f32 %v954_v57, 0.0  ;;  %v1887_v57 = vld [vmem:[%s2494_s5 + $0x20] sm:$0xff] }
 0x5ec   :  { %v967_v4 = vpack.c.bf16 %v963_v61, %v962_v60  ;;  %v1958_v60 = vld [vmem:[%s2496_s13 + $0x1] ss:$0 sm:$0xff] }
 0x5ed   :  { %1100 = vmatpush.bf16.msrb.mxu2 %v1888_v56 }
 0x5ee   :  { %972 = vmatpush.bf16.msrb.mxu3 %v967_v4 }
 0x5f1   :  { %1101 = vmatpush.bf16.msrb.mxu2 %v1887_v57 }
 0x5f2   :  { %973 = vmatpush.bf16.msrb.mxu3 %v966_v11 }
 0x5f5   :  { %1224 = vmatpush.bf16.msra.mxu2 %v1896_v25  ;;  %v1963_v25 = vld [vmem:[%s2510_s2] ss:$0 sm:$0xff] }
 0x5f6   :  { %974 = vmatpush.bf16.msrb.mxu3 %v965_v27  ;;  %v1894_v27 = vld [vmem:[%s2497_s17 + $0x28] sm:$0xff] }
 0x5f9   :  { %1225 = vmatpush.bf16.msra.mxu2 %v1895_v26 }
 0x5fa   :  { %975 = vmatpush.bf16.msrb.mxu3 %v964_v30 }
 0x5fd   :  { %1718 = vmatmul.msk.bf16.vlgmr.msrb.gmra.mxu3 %vm419_vm4, %v2282_v13  ;;  %v1886_v13 = vld [vmem:[%s2122_s27 + $0x18] sm:$0xff]  ;;  %1226 = vmatpush.bf16.msra.mxu2 %v1894_v27 }
 0x5fe   :  { %1031 = vmatpush.bf16.msrb.mxu1 %v1886_v13  ;;  %v1898_v13 = vld [vmem:[%s2499_s25 + $0x18] sm:$0xff] }
 0x601   :  { %1227 = vmatpush.bf16.msra.mxu2 %v1893_v29 }
 0x60d   :  { %1719 = vmatmul.msk.bf16.gmra.mxu3 %vm419_vm4, %v2287_v17  ;;  %v1885_v17 = vld [vmem:[%s2122_s27 + $0x10] sm:$0xff]  ;;  %s2508_s27 = sld [smem:[#allocation19_spill]] }
 0x60e   :  { %1032 = vmatpush.bf16.msrb.mxu1 %v1885_v17  ;;  %v1897_v17 = vld [vmem:[%s2499_s25 + $0x10] sm:$0xff] }
 0x612   :  { %1168 = vmatpush.bf16.msra.mxu1 %v1892_v0 }
 0x616   :  { %1169 = vmatpush.bf16.msra.mxu1 %v1891_v1 }
 0x647   :  { %v876_v33 = vpop.f32.mrf.mxu3 }
 0x648   :  { %v891_v38 = vmul.f32 %v884_v37, %v876_v33  ;;  %v1959_v33 = vld [vmem:[%s2498_s21 + $0x1] ss:$0 sm:$0xff] }
 0x64a   :  { %v893_v40 = vadd.f32 %v891_v38, %v694_v35 }
 0x64c   :  { %v1132_v49 = vmul.f32 1.15, %v893_v40 }
 0x64f   :  { %v878_v20 = vpop.f32.mrf.mxu3 }
 0x650   :  { %v892_v39 = vmul.f32 %v889_v28, %v878_v20 }
 0x652   :  { %v894_v21 = vadd.f32 %v892_v39, %v695_v36 }
 0x654   :  { %v1117_v41 = vpack.c.bf16 %v894_v21, %v893_v40 }
 0x656   :  { %1125 = vmatpush.bf16.msra.mxu3 %v1117_v41 }
 0x659   :  { %1762 = vmatmul.msk.bf16.vlgmr.msra.gmra.mxu3 %vm178_vm1, %v2301_v43  ;;  %v989_v43 = vmul.f32 1.2, %v2370_v19  ;;  %v1133_v19 = vmul.f32 1.15, %v894_v21 }
 0x65a   :  { %1268 = vmatpush.bf16.msrb.mxu3 %v1898_v13 }
 0x65e   :  { %1269 = vmatpush.bf16.msrb.mxu3 %v1897_v17  ;;  %v1964_v17 = vld [vmem:[%s2512_s10] ss:$0 sm:$0xff] }
 0x680   :  { %v977_v18 = vpop.f32.mrf.mxu3 }
 0x681   :  { %v991_v35 = vadd.f32 %v987_v24, %v977_v18 }
 0x688   :  { %v979_v32 = vpop.f32.mrf.mxu3 }
 0x689   :  { %v992_v34 = vadd.f32 %v988_v16, %v979_v32  ;;  %v1961_v32 = vld [vmem:[%s2500_s8 + $0x1] ss:$0 sm:$0xff] }
 0x68b   :  { %v1000_v36 = vpack.c.bf16 %v992_v34, %v991_v35 }
 0x68d   :  { %1733 = vmatmul.msk.bf16.vlgmr.msrb.gmra.mxu1 %vm351_vm3, %v1000_v36 }
 0x690   :  { %v982_v31 = vpop.f32.mrf.mxu3 }
 0x691   :  { %v993_v45 = vadd.f32 %v989_v43, %v982_v31 }
 0x698   :  { %v984_v44 = vpop.f32.mrf.mxu3 }
 0x699   :  { %v994_v14 = vadd.f32 %v990_v42, %v984_v44 }
 0x69b   :  { %v1001_v47 = vpack.c.bf16 %v994_v14, %v993_v45  ;;  %v1962_v45 = vld [vmem:[%s2502_s24 + $0x1] ss:$0 sm:$0xff] }
 0x69d   :  { %1734 = vmatmul.msk.bf16.gmra.mxu1 %vm351_vm3, %v1001_v47 }
 0x6dc   :  { %v1127_v48 = vpop.f32.mrf.mxu3 }
 0x6dd   :  { %v1134_v22 = vadd.f32 %v1132_v49, %v1127_v48 }
 0x6e4   :  { %v1129_v50 = vpop.f32.mrf.mxu3 }
 0x6e5   :  { %v1135_v51 = vadd.f32 %v1133_v19, %v1129_v50  ;;  %v1900_v19 = vld [vmem:[%s2508_s27 + $0x8] sm:$0xff]  ;;  %v1899_v50 = vld [vmem:[%s2508_s27] sm:$0xff] }
 0x6e6   :  { %1340 = vmatpush.bf16.msrb.mxu1 %v1900_v19 }
 0x6e7   :  { %v1141_v52 = vpack.c.bf16 %v1135_v51, %v1134_v22  ;;  %v1960_v51 = vld [vmem:[%s2505_s12 + $0x1] ss:$0 sm:$0xff] }
 0x6e9   :  { %1776 = vmatmul.msk.bf16.vlgmr.msra.gmra.mxu1 %vm351_vm3, %v1141_v52 }
 0x6ea   :  { %1341 = vmatpush.bf16.msrb.mxu1 %v1899_v50 }
 0x70a   :  { %v1034_v58 = vpop.f32.mrf.mxu1 }
 0x70b   :  { %v1035_v61 = vadd.f32 %v1958_v60, %v1034_v58 }
 0x70d   :  { %v1044_v2 = vmax.f32 %v1035_v61, 0.0 }
 0x712   :  { %v1036_v62 = vpop.f32.mrf.mxu1 }
 0x713   :  { %v1037_v63 = vadd.f32 %v1958_v60, %v1036_v62 }
 0x715   :  { %v1045_v4 = vmax.f32 %v1037_v63, 0.0 }
 0x717   :  { %v1057_v5 = vpack.c.bf16 %v1045_v4, %v1044_v2 }
 0x719   :  { %1760 = vmatmul.msk.bf16.vlgmr.msrb.gmra.mxu2 %vm419_vm4, %v1057_v5 }
 0x71a   :  { %v1039_v6 = vpop.f32.mrf.mxu1 }
 0x71b   :  { %v1040_v7 = vadd.f32 %v1958_v60, %v1039_v6 }
 0x71d   :  { %v1046_v11 = vmax.f32 %v1040_v7, 0.0 }
 0x722   :  { %v1041_v9 = vpop.f32.mrf.mxu1 }
 0x723   :  { %v1042_v10 = vadd.f32 %v1958_v60, %v1041_v9 }
 0x725   :  { %v1047_v12 = vmax.f32 %v1042_v10, 0.0 }
 0x727   :  { %v1058_v23 = vpack.c.bf16 %v1047_v12, %v1046_v11  ;;  %v1902_v11 = vld [vmem:[%s2509_s1 + $0x8] sm:$0xff]  ;;  %v1901_v12 = vld [vmem:[%s2509_s1] sm:$0xff] }
 0x728   :  { %1391 = vmatpush.bf16.msrb.mxu2 %v1902_v11 }
 0x729   :  { %1761 = vmatmul.msk.bf16.gmra.mxu2 %vm419_vm4, %v1058_v23 }
 0x72c   :  { %1392 = vmatpush.bf16.msrb.mxu2 %v1901_v12 }
 0x766   :  { %v1171_v30 = vpop.f32.mrf.mxu1 }
 0x767   :  { %v1172_v37 = vadd.f32 %v1959_v33, %v1171_v30 }
 0x769   :  { %v1176_v20 = vmax.f32 %v1172_v37, 0.0 }
 0x76e   :  { %v1173_v38 = vpop.f32.mrf.mxu1 }
 0x76f   :  { %v1174_v28 = vadd.f32 %v1959_v33, %v1173_v38 }
 0x771   :  { %v1177_v39 = vmax.f32 %v1174_v28, 0.0 }
 0x773   :  { %v1187_v40 = vpack.c.bf16 %v1177_v39, %v1176_v20 }
 0x775   :  { %1802 = vmatmul.msk.bf16.vlgmr.msra.gmra.mxu2 %vm419_vm4, %v1187_v40 }
 0x79c   :  { %v1103_v21 = vpop.f32.mrf.mxu2 }
 0x79d   :  { %v1104_v52 = vadd.f32 %v1960_v51, %v1103_v21  ;;  %v1904_v21 = vld [vmem:[%s2511_s7 + $0x8] sm:$0xff] }
 0x79e   :  { %1442 = vmatpush.bf16.msra.mxu3 %v1904_v21 }
 0x79f   :  { %v1113_v57 = vmax.f32 %v1104_v52, 0.0 }
 0x7a4   :  { %v1105_v41 = vpop.f32.mrf.mxu2 }
 0x7a5   :  { %v1106_v54 = vadd.f32 %v1960_v51, %v1105_v41  ;;  %v1903_v41 = vld [vmem:[%s2511_s7] sm:$0xff] }
 0x7a6   :  { %1443 = vmatpush.bf16.msra.mxu3 %v1903_v41 }
 0x7a7   :  { %v1114_v58 = vmax.f32 %v1106_v54, 0.0 }
 0x7ac   :  { %v1108_v18 = vpop.f32.mrf.mxu2 }
 0x7ad   :  { %v1109_v63 = vadd.f32 %v1960_v51, %v1108_v18 }
 0x7b4   :  { %v1110_v24 = vpop.f32.mrf.mxu2 }
 0x7b5   :  { %v1111_v2 = vadd.f32 %v1960_v51, %v1110_v24 }
 0x7b7   :  { %v1116_v6 = vmax.f32 %v1111_v2, 0.0 }
 0x7f8   :  { %v1229_v16 = vpop.f32.mrf.mxu2 }
 0x7f9   :  { %v1230_v35 = vadd.f32 %v1961_v32, %v1229_v16 }
 0x7fb   :  { %v1234_v31 = vmax.f32 %v1230_v35, 0.0 }
 0x800   :  { %v1231_v34 = vpop.f32.mrf.mxu2 }
 0x801   :  { %v1232_v36 = vadd.f32 %v1961_v32, %v1231_v34 }
 0x803   :  { %v1235_v43 = vmax.f32 %v1232_v36, 0.0 }
 0x805   :  { %v1241_v42 = vpack.c.bf16 %v1235_v43, %v1234_v31 }
 0x807   :  { %1816 = vmatmul.msk.bf16.vlgmr.msrb.gmra.mxu3 %vm351_vm3, %v1241_v42 }
 0x88a   :  { %v1271_v44 = vpop.f32.mrf.mxu3 }
 0x88b   :  { %v1272_v14 = vadd.f32 %v1962_v45, %v1271_v44 }
 0x88d   :  { %v1276_v1 = vmax.f32 %v1272_v14, 0.0 }
 0x892   :  { %v1273_v47 = vpop.f32.mrf.mxu3 }
 0x893   :  { %v1274_v0 = vadd.f32 %v1962_v45, %v1273_v47  ;;  %v1459_v47 = vld [vmem:[%s2212_s3] sm:$0xf]  ;;  %s2031_s3 = smov [#allocation2]  }
 0x895   :  { %v1277_v48 = vmax.f32 %v1274_v0, 0.0  ;;  %v1473_v0 = vsel %vm220_vm0, %v1459_v47, 0 }
 0x897   :  { %v1278_v49 = vpack.c.bf16 %v1277_v48, %v1276_v1  ;;  %v1965_v48 = vld [vmem:[%s2207_s4] ss:$0 sm:$0xff]  ;;  %s1502_s4 = sshll.u32 %s2031_s3, 4  ;;  %s1503_s4 = int_to_ptr.vmem [resolvable:$true] %s1502_s4 }
 0x899   :  { %1286 = vmatpush.bf16.msrb.mxu0 %v1278_v49 }
 0x89c   :  { %1817 = vmatmul.msk.bf16.vlgmr.msrb.gmra.mxu0 %vm178_vm1, %v2339_v15 }
 0x89d   :  { %1482 = vmatpush.bf16.msra.mxu0 %v1473_v0 }
 0x8ac   :  { %1818 = vmatmul.msk.bf16.gmra.mxu0 %vm178_vm1, %v2344_v46 }
 0x919   :  { %v1288_v22 = vpop.f32.mrf.mxu0 }
 0x91a   :  { %v1298_v55 = vmul.f32 %v1288_v22, %v2350_v53  ;;  %v1115_v53 = vmax.f32 %v1109_v63, 0.0 }
 0x91c   :  { %v1302_v61 = vadd.f32 %v1298_v55, %v1113_v57 }
 0x921   :  { %v1290_v56 = vpop.f32.mrf.mxu0 }
 0x922   :  { %v1299_v60 = vmul.f32 %v1290_v56, %v2354_v59 }
 0x924   :  { %v1303_v15 = vadd.f32 %v1299_v60, %v1114_v58 }
 0x926   :  { %v1310_v62 = vpack.c.bf16 %v1303_v15, %v1302_v61  ;;  %v1966_v15 = vld [vmem:[%s2217_s29] ss:$0 sm:$0xff]  ;;  %s1979_s29 = sshra.s32 %s1505_s11, 4  ;;  %s1980_s29 = int_to_ptr.hbm [resolvable:$true] %s1979_s29 }
 0x927   :  { %s1981_s15 = scalar_lea.hbm %s1980_s29, 32  ;;  %p1984_p1 = scmp.lt.s32.totalorder %s1980_s29, %s2222_s14 }
 0x928   :  { %1827 = vmatmul.msk.bf16.vlgmr.msrb.gmra.mxu1 %vm351_vm3, %v1310_v62  ;;  %p1982_p0 = scmp.ne.s32.totalorder %s1980_s29, %s1981_s15  ;;  %p1985_p2 = scmp.lt.s32.totalorder %s1983_s16, %s1981_s15 }
 0x929   :  { %v1293_v46 = vpop.f32.mrf.mxu0 }
 0x92a   :  { %v1300_v4 = vmul.f32 %v1293_v46, %v2363_v3  ;;  %p1986_p3 = por %p1985_p2, %p1984_p1 }
 0x92c   :  { %v1304_v9 = vadd.f32 %v1300_v4, %v1115_v53  ;;  %p1987_p4 = pnand %p1986_p3, %p1982_p0 }
 0x931   :  { %v1295_v5 = vpop.f32.mrf.mxu0 }
 0x932   :  { %v1301_v7 = vmul.f32 %v1295_v5, %v2367_v8 }
 0x934   :  { %v1305_v59 = vadd.f32 %v1301_v7, %v1116_v6 }
 0x936   :  { %v1311_v10 = vpack.c.bf16 %v1305_v59, %v1304_v9 }
 0x938   :  { %1828 = vmatmul.msk.bf16.gmra.mxu1 %vm351_vm3, %v1311_v10 }
 0x9a5   :  { %v1343_v23 = vpop.f32.mrf.mxu1 }
 0x9a6   :  { %v1344_v26 = vadd.f32 %v1963_v25, %v1343_v23 }
 0x9a8   :  { %v1353_v29 = vmax.f32 %v1344_v26, 0.0 }
 0x9ad   :  { %v1345_v27 = vpop.f32.mrf.mxu1 }
 0x9ae   :  { %v1346_v3 = vadd.f32 %v1963_v25, %v1345_v27 }
 0x9b0   :  { %v1354_v30 = vmax.f32 %v1346_v3, 0.0 }
 0x9b2   :  { %v1361_v8 = vpack.c.bf16 %v1354_v30, %v1353_v29 }
 0x9b4   :  { %1837 = vmatmul.msk.bf16.vlgmr.msrb.gmra.mxu2 %vm351_vm3, %v1361_v8 }
 0x9b5   :  { %v1348_v33 = vpop.f32.mrf.mxu1 }
 0x9b6   :  { %v1349_v37 = vadd.f32 %v1963_v25, %v1348_v33 }
 0x9b8   :  { %v1355_v20 = vmax.f32 %v1349_v37, 0.0 }
 0x9bd   :  { %v1350_v38 = vpop.f32.mrf.mxu1 }
 0x9be   :  { %v1351_v28 = vadd.f32 %v1963_v25, %v1350_v38 }
 0x9c0   :  { %v1356_v39 = vmax.f32 %v1351_v28, 0.0 }
 0x9c2   :  { %v1362_v40 = vpack.c.bf16 %v1356_v39, %v1355_v20 }
 0x9c4   :  { %1838 = vmatmul.msk.bf16.gmra.mxu2 %vm351_vm3, %v1362_v40 }
 0xa37   :  { %v1394_v13 = vpop.f32.mrf.mxu2 }
 0xa38   :  { %v1395_v18 = vadd.f32 %v1964_v17, %v1394_v13 }
 0xa3a   :  { %v1404_v32 = vmax.f32 %v1395_v18, 0.0 }
 0xa3f   :  { %v1396_v24 = vpop.f32.mrf.mxu2 }
 0xa40   :  { %v1397_v16 = vadd.f32 %v1964_v17, %v1396_v24 }
 0xa42   :  { %v1405_v35 = vmax.f32 %v1397_v16, 0.0 }
 0xa44   :  { %v1412_v34 = vpack.c.bf16 %v1405_v35, %v1404_v32 }
 0xa46   :  { %1847 = vmatmul.msk.bf16.vlgmr.msra.gmra.mxu3 %vm351_vm3, %v1412_v34 }
 0xa47   :  { %v1399_v36 = vpop.f32.mrf.mxu2 }
 0xa48   :  { %v1400_v31 = vadd.f32 %v1964_v17, %v1399_v36 }
 0xa4a   :  { %v1406_v44 = vmax.f32 %v1400_v31, 0.0 }
 0xa4f   :  { %v1401_v43 = vpop.f32.mrf.mxu2 }
 0xa50   :  { %v1402_v42 = vadd.f32 %v1964_v17, %v1401_v43 }
 0xa52   :  { %v1407_v45 = vmax.f32 %v1402_v42, 0.0 }
 0xa54   :  { %v1413_v14 = vpack.c.bf16 %v1407_v45, %v1406_v44 }
 0xa56   :  { %1848 = vmatmul.msk.bf16.gmra.mxu3 %vm351_vm3, %v1413_v14 }
 0xac9   :  { %v1445_v1 = vpop.f32.mrf.mxu3 }
 0xaca   :  { %v1446_v49 = vadd.f32 %v1965_v48, %v1445_v1 }
 0xacc   :  { %v1455_v22 = vmax.f32 %v1446_v49, 0.0 }
 0xad1   :  { %v1447_v19 = vpop.f32.mrf.mxu3 }
 0xad2   :  { %v1448_v50 = vadd.f32 %v1965_v48, %v1447_v19 }
 0xad4   :  { %v1456_v51 = vmax.f32 %v1448_v50, 0.0 }
 0xad6   :  { %v1460_v52 = vpack.c.bf16 %v1456_v51, %v1455_v22 }
 0xad8   :  { %1849 = vmatmul.msk.bf16.vlgmr.msra.gmra.mxu0 %vm216_vm2, %v1460_v52 }
 0xad9   :  { %v1450_v54 = vpop.f32.mrf.mxu3 }
 0xada   :  { %v1451_v55 = vadd.f32 %v1965_v48, %v1450_v54 }
 0xadc   :  { %v1457_v58 = vmax.f32 %v1451_v55, 0.0 }
 0xae1   :  { %v1452_v56 = vpop.f32.mrf.mxu3 }
 0xae2   :  { %v1453_v57 = vadd.f32 %v1965_v48, %v1452_v56 }
 0xae4   :  { %v1458_v60 = vmax.f32 %v1453_v57, 0.0 }
 0xae6   :  { %v1461_v61 = vpack.c.bf16 %v1458_v60, %v1457_v58 }
 0xae8   :  { %1850 = vmatmul.msk.bf16.gmra.mxu0 %vm216_vm2, %v1461_v61 }
 0xb55   :  { %v1484_v62 = vpop.f32.mrf.mxu0 }
 0xb56   :  { %v1485_v46 = vadd.f32 %v1966_v15, %v1484_v62 }
 0xb58   :  { %1494 = vst [vmem:[#allocation2] sm:$0xff] %v1485_v46 }
 0xb5d   :  { %v1486_v63 = vpop.f32.mrf.mxu0 }
 0xb5e   :  { %v1487_v2 = vadd.f32 %v1966_v15, %v1486_v63 }
 0xb60   :  { %1495 = vst [vmem:[#allocation2 + $0x8] sm:$0xff] %v1487_v2 }
 0xb65   :  { %v1489_v4 = vpop.f32.mrf.mxu0 }
 0xb66   :  { %v1490_v5 = vadd.f32 %v1966_v15, %v1489_v4 }
 0xb68   :  { %1496 = vst [vmem:[#allocation2 + $0x10] sm:$0xff] %v1490_v5 }
 0xb6d   :  { %v1491_v53 = vpop.f32.mrf.mxu0 }
 0xb6e   :  { %v1492_v6 = vadd.f32 %v1966_v15, %v1491_v53 }
 0xb70   :  { %1497 = vst [vmem:[#allocation2 + $0x18] sm:$0xff] %v1492_v6 }
 0xb71   :  { %1990 = shalt.err (!%p1987_p4)
}
 0xb72   :  { %s2032_s18 = smov 128   ;;  %s2033_s22 = smov 8  }
 0xb73   :  { %1510 = dma.vmem_to_hbm [thread:$0]  %s1503_s4, 512, %s1505_s11, [#allocation3], %s2032_s18, %s2032_s18, %s2033_s22  }
 0xb74   :  { %1991 = dma.done.wait [#allocation3], 512  }
 0xb75   :  { %1992 = vsyncadd [#allocation3], 4294966784 }
 0xb76   :  { %1515 = vsyncpa [#allocation3], 1 }

</bundles_post_ra>
